<compile_context>
chip_gen: v6e
topology: v6e:2x2x1
jax: 0.10.0
libtpu: 0.0.40
codegen_flags: <defaults>
</compile_context>

<pallas_src>
import functools
import math

import jax
import jax.numpy as jnp
from jax.experimental import pallas as pl
from jax.experimental.pallas import tpu as pltpu

FILTERS = (1, 3, 3, 3, 3, 1)          # (1,) + (3,3,3,3) + (1,)  (CompressAI default)
INIT_SCALE = 10.0
LIKELIHOOD_BOUND = 1e-9


# ---------------------------------------------------------------------------
# numerics helpers (host packing + pure-JAX reference)
# ---------------------------------------------------------------------------
def _softplus(x):
    return jnp.where(x > 0, x + jnp.log1p(jnp.exp(-x)), jnp.log1p(jnp.exp(x)))


def _sigmoid(x):
    return 0.5 * (jnp.tanh(0.5 * x) + 1.0)


# ---------------------------------------------------------------------------
# parameter packing layout (static Python metadata, closed over by the kernel)
# ---------------------------------------------------------------------------
def _param_layout():
    off = 0
    layers = []
    nl = len(FILTERS) - 1
    for i in range(nl):
        fin, fout = FILTERS[i], FILTERS[i + 1]
        w_off = off
        off += fout * fin
        b_off = off
        off += fout
        fac_off = None
        if i < nl - 1:
            fac_off = off
            off += fout
        layers.append((fin, fout, w_off, b_off, fac_off))
    med_off = off
    off += 1
    return layers, med_off, off


def init_entropy_bottleneck_params(key, channels):
    """Deterministic init matching EntropyBottleneck.__init__ shapes/values.

    The packed slab stores the *transformed* per-channel params
    (softplus(matrix_i), bias_i, tanh(factor_i), median) so the kernel does no
    per-tile softplus/tanh on parameters.  `raw` keeps the untransformed
    PyTorch-equivalent parameters for the pure-JAX reference.
    """
    layers, _, total = _param_layout()
    nl = len(FILTERS) - 1
    scale = INIT_SCALE ** (1.0 / nl)
    raw = {}
    packed = []
    keys = jax.random.split(key, nl)
    for i, (fin, fout, _, _, fac_off) in enumerate(layers):
        init = math.log(math.expm1(1.0 / scale / FILTERS[i + 1]))
        W = jnp.full((channels, fout, fin), init, jnp.float32)       # _matrix{i}
        b = jax.random.uniform(keys[i], (channels, fout), jnp.float32,
                               minval=-0.5, maxval=0.5)              # _bias{i}
        raw[f"matrix{i}"] = W
        raw[f"bias{i}"] = b
        packed.append(_softplus(W).reshape(channels, fout * fin))    # pre-softplus'd
        packed.append(b)
        if fac_off is not None:
            fac = jnp.zeros((channels, fout), jnp.float32)           # _factor{i}
            raw[f"factor{i}"] = fac
            packed.append(jnp.tanh(fac))                             # pre-tanh'd
    quantiles = jnp.tile(jnp.array([[-INIT_SCALE, 0.0, INIT_SCALE]], jnp.float32),
                         (channels, 1))                              # quantiles
    raw["quantiles"] = quantiles
    packed.append(quantiles[:, 1:2])                                 # medians
    packed = jnp.concatenate(packed, axis=1)                         # (C, total)
    p_pad = max(128, ((total + 127) // 128) * 128)
    packed = jnp.pad(packed, ((0, 0), (0, p_pad - total)))
    return packed, raw


# ---------------------------------------------------------------------------
# generation-aware knobs
# ---------------------------------------------------------------------------
def _vmem_capacity_bytes():
    try:
        return int(pltpu.get_tpu_info().vmem_capacity_bytes)
    except Exception:
        pass
    try:
        kind = jax.devices()[0].device_kind.lower()
    except Exception:
        kind = ""
    if "v7" in kind or "7x" in kind:
        return 64 * 1024 * 1024                      # v7x: 64 MiB per TC
    return 128 * 1024 * 1024                         # v5e / v6e


def _default_tanh_dtype():
    # bf16 EUP path exists on v6e/v7x (~2x transcendental rate); v5e is f32 only.
    try:
        kind = jax.devices()[0].device_kind.lower()
    except Exception:
        kind = ""
    if "v6" in kind or "v7" in kind or "7x" in kind:
        return jnp.bfloat16
    return jnp.float32
    # TODO(synk): on v5e, if profiling confirms EUP saturation, offload part of
    # the factor tanhs to a clamped odd polynomial on the VPU instead.


# ---------------------------------------------------------------------------
# Pallas kernel
# ---------------------------------------------------------------------------
def _eb_kernel(x_ref, p_ref, y_ref, lik_ref, *, layers, med_off, tanh_dtype):
    p = p_ref[...]                                   # (C, P) transformed params
    x = x_ref[...]                                   # (C, TM) values

    med = p[:, med_off][:, None]                     # (C, 1)
    # quantize in "dequantize" (eval) mode: round around the medians.
    # TODO(synk): training-mode additive uniform noise would use pltpu.prng_*.
    y = jnp.round(x - med) + med
    y_ref[...] = y

    def _t(v):
        # tanh in tanh_dtype (bf16 on v6e/v7x to double EUP throughput),
        # accumulation stays f32.
        return jnp.tanh(v.astype(tanh_dtype)).astype(jnp.float32)

    # Two fully-unrolled cumulative-logits chains (lower = y-0.5, upper = y+0.5)
    # sharing every per-channel parameter broadcast.  Filters are tiny (<=3):
    # pure broadcasted VPU ops + EUP tanh, no MXU, no concat/slice copies.
    lo = [y - 0.5]
    up = [y + 0.5]
    for (fin, fout, w_off, b_off, fac_off) in layers:
        new_lo, new_up = [], []
        for j in range(fout):
            w0 = p[:, w_off + j * fin][:, None]      # hoisted, reused by both
            acc_l = w0 * lo[0]
            acc_u = w0 * up[0]
            for k in range(1, fin):
                wk = p[:, w_off + j * fin + k][:, None]
                acc_l = acc_l + wk * lo[k]
                acc_u = acc_u + wk * up[k]
            b = p[:, b_off + j][:, None]
            acc_l = acc_l + b
            acc_u = acc_u + b
            if fac_off is not None:
                f = p[:, fac_off + j][:, None]
                acc_l = acc_l + f * _t(acc_l)
                acc_u = acc_u + f * _t(acc_u)
            new_lo.append(acc_l)
            new_up.append(acc_u)
        lo, up = new_lo, new_up
    lower = lo[0]                                    # (C, TM)
    upper = up[0]                                    # (C, TM)

    # sigmoid(b) - sigmoid(a) = 0.5*(tanh(b/2) - tanh(a/2)); tanh is odd, so
    # |sigmoid(s*u) - sigmoid(s*l)| == 0.5*|tanh(u/2) - tanh(l/2)| for s = +-1.
    # (Behavioral note: at the measure-zero point l+u == 0, CompressAI's
    # sign(0)=0 path returns the 1e-9 bound; this form returns the true value.)
    lik = 0.5 * jnp.abs(_t(0.5 * upper) - _t(0.5 * lower))
    lik_ref[...] = jnp.maximum(lik, LIKELIHOOD_BOUND)   # likelihood lower bound


def compression_model_forward(x, packed_params, *, tile_hw=8192, tanh_dtype=None):
    """EntropyBottleneck forward: x (N,C,H,W) -> (y_hat, likelihoods), same shape."""
    N, C, H, W = x.shape
    HW = H * W
    P = packed_params.shape[1]
    layers, med_off, _ = _param_layout()
    if tanh_dtype is None:
        tanh_dtype = _default_tanh_dtype()

    # --- generation-aware VMEM budgets -------------------------------------
    vmem_cap = _vmem_capacity_bytes()
    sizing_budget = vmem_cap // 2                    # 32 MiB on v7x, 64 MiB on v5e/v6e
    vmem_limit = vmem_cap - vmem_cap // 4            # 48 MiB on v7x, 96 MiB on v5e/v6e

    # --- tile sizing: ~16 block-sized f32 live slabs (2 chain temps per branch
    # + x/y/lik + input/output double buffers) must fit the sizing budget;
    # keep the lane dim a 128-multiple.
    bytes_per_lane = C * 4
    max_tile = max(128, (sizing_budget // (16 * bytes_per_lane)) // 128 * 128)
    t = max(128, min((tile_hw // 128) * 128, max_tile))
    hw_128 = ((HW + 127) // 128) * 128
    if hw_128 <= t:
        t = hw_128                                   # whole image row per step
        # megacore (v7x): for N == 1 make sure there are >= 2 grid points so
        # both TensorCores get work (negligible cost on single-TC chips).
        if N == 1 and hw_128 >= 256:
            t = ((hw_128 // 2 + 127) // 128) * 128
    Mp = ((HW + t - 1) // t) * t

    xr = x.reshape(N, C, HW).astype(jnp.float32)     # no transpose needed
    if Mp != HW:
        xr = jnp.pad(xr, ((0, 0), (0, 0), (0, Mp - HW)))

    kernel = functools.partial(_eb_kernel, layers=layers, med_off=med_off,
                               tanh_dtype=tanh_dtype)

    y, lik = pl.pallas_call(
        kernel,
        out_shape=(jax.ShapeDtypeStruct((N, C, Mp), jnp.float32),
                   jax.ShapeDtypeStruct((N, C, Mp), jnp.float32)),
        grid=(N, Mp // t),
        in_specs=[
            pl.BlockSpec((None, C, t), lambda n, m: (n, 0, m)),  # values tile
            pl.BlockSpec((C, P), lambda n, m: (0, 0)),           # params (resident,
                                                                 # constant index map
                                                                 # -> fetched once)
        ],
        out_specs=(
            pl.BlockSpec((None, C, t), lambda n, m: (n, 0, m)),
            pl.BlockSpec((None, C, t), lambda n, m: (n, 0, m)),
        ),
        compiler_params=pltpu.CompilerParams(
            dimension_semantics=("parallel", "parallel"),
            vmem_limit_bytes=int(vmem_limit),
        ),
    )(xr, packed_params.astype(jnp.float32))

    y = y[:, :, :HW].reshape(N, C, H, W)
    lik = lik[:, :, :HW].reshape(N, C, H, W)
    return y, lik


# ---------------------------------------------------------------------------
# pure-JAX reference (mirrors the PyTorch EntropyBottleneck eval forward)
# ---------------------------------------------------------------------------
def reference_forward(x, raw):
    N, C, H, W = x.shape
    v = jnp.transpose(x, (1, 0, 2, 3)).reshape(C, 1, -1).astype(jnp.float32)
    med = raw["quantiles"][:, 1:2][:, :, None]                  # (C,1,1)
    y = jnp.round(v - med) + med

    def cum(inp):
        logits = inp
        nl = len(FILTERS) - 1
        for i in range(nl):
            logits = jnp.matmul(_softplus(raw[f"matrix{i}"]), logits)
            logits = logits + raw[f"bias{i}"][:, :, None]
            if i < nl - 1:
                f = raw[f"factor{i}"][:, :, None]
                logits = logits + jnp.tanh(f) * jnp.tanh(logits)
        return logits

    lower = cum(y - 0.5)
    upper = cum(y + 0.5)
    sign = -jnp.sign(lower + upper)
    lik = jnp.abs(_sigmoid(sign * upper) - _sigmoid(sign * lower))
    lik = jnp.maximum(lik, LIKELIHOOD_BOUND)
    y = y.reshape(C, N, H, W).transpose(1, 0, 2, 3)
    lik = lik.reshape(C, N, H, W).transpose(1, 0, 2, 3)
    return y, lik


if __name__ == "__main__":
    key = jax.random.PRNGKey(0)
    kx, kp = jax.random.split(key)
    N, C, H, W = 2, 8, 16, 16          # entropy_bottleneck_channels = 8
    x = jax.random.normal(kx, (N, C, H, W), jnp.float32) * 3.0

    packed, raw = init_entropy_bottleneck_params(kp, C)

    tanh_dtype = _default_tanh_dtype()
    y, lik = compression_model_forward(x, packed, tanh_dtype=tanh_dtype)
    jax.block_until_ready((y, lik))

    y_ref, lik_ref = reference_forward(x, raw)
    assert y.shape == x.shape and lik.shape == x.shape
    # y is always computed in f32; lik tolerance depends on the tanh precision.
    lik_atol = 1e-2 if tanh_dtype == jnp.bfloat16 else 1e-5
    assert jnp.allclose(y, y_ref, atol=1e-5), "quantized outputs mismatch"
    assert jnp.allclose(lik, lik_ref, atol=lik_atol), "likelihoods mismatch"

    print("KERNEL_OK")
</pallas_src>

<mosaic_0001>
module attributes {stable_mosaic.version = 11 : i64} {
  func.func @_eb_kernel(%arg0: i32, %arg1: i32, %arg2: memref<1x8x256xf32, #tpu.memory_space<vmem>>, %arg3: memref<8x128xf32, #tpu.memory_space<vmem>>, %arg4: memref<1x8x256xf32, #tpu.memory_space<vmem>>, %arg5: memref<1x8x256xf32, #tpu.memory_space<vmem>>) attributes {dimension_semantics = [#tpu.dimension_semantics<parallel>, #tpu.dimension_semantics<parallel>], iteration_bounds = array<i64: 2, 1>, scalar_prefetch = 0 : i64, scratch_operands = 0 : i64, tpu.core_type = #tpu.core_type<tc>, window_params = [{transform_indices = @transform_0, window_bounds = array<i64: 1, 8, 256>}, {pipeline_mode = #tpu.pipeline_mode<synchronous>, transform_indices = @transform_1, window_bounds = array<i64: 8, 128>}, {transform_indices = @transform_2, window_bounds = array<i64: 1, 8, 256>}, {transform_indices = @transform_3, window_bounds = array<i64: 1, 8, 256>}]} {
    %c0 = arith.constant 0 : index
    %c0_0 = arith.constant 0 : index
    %0 = vector.load %arg3[%c0, %c0_0] : memref<8x128xf32, #tpu.memory_space<vmem>>, vector<8x128xf32>
    %c0_1 = arith.constant 0 : index
    %c0_2 = arith.constant 0 : index
    %c0_3 = arith.constant 0 : index
    %1 = vector.load %arg2[%c0_1, %c0_2, %c0_3] : memref<1x8x256xf32, #tpu.memory_space<vmem>>, vector<1x8x256xf32>
    %2 = vector.shape_cast %1 : vector<1x8x256xf32> to vector<8x256xf32>
    %3 = vector.extract_strided_slice %0 {offsets = [0, 58], sizes = [8, 1], strides = [1, 1]} : vector<8x128xf32> to vector<8x1xf32>
    %4 = vector.shape_cast %3 : vector<8x1xf32> to vector<8xf32>
    %5 = vector.shape_cast %4 : vector<8xf32> to vector<8x1xf32>
    %6 = vector.broadcast %5 : vector<8x1xf32> to vector<8x256xf32>
    %7 = arith.subf %2, %6 : vector<8x256xf32>
    %8 = math.roundeven %7 : vector<8x256xf32>
    %9 = vector.broadcast %5 : vector<8x1xf32> to vector<8x256xf32>
    %10 = arith.addf %8, %9 : vector<8x256xf32>
    %c0_4 = arith.constant 0 : index
    %c0_5 = arith.constant 0 : index
    %c0_6 = arith.constant 0 : index
    %11 = vector.load %arg4[%c0_4, %c0_5, %c0_6] : memref<1x8x256xf32, #tpu.memory_space<vmem>>, vector<1x8x256xf32>
    %12 = vector.shape_cast %11 : vector<1x8x256xf32> to vector<8x256xf32>
    %13 = vector.shape_cast %10 : vector<8x256xf32> to vector<1x8x256xf32>
    tpu.vector_store %arg4[%c0_4, %c0_5, %c0_6], %13 {strides = array<i32>} : memref<1x8x256xf32, #tpu.memory_space<vmem>>, vector<1x8x256xf32>,
    %cst = arith.constant 5.000000e-01 : f32
    %14 = vector.broadcast %cst : f32 to vector<8x256xf32>
    %15 = arith.subf %10, %14 : vector<8x256xf32>
    %cst_7 = arith.constant 5.000000e-01 : f32
    %16 = vector.broadcast %cst_7 : f32 to vector<8x256xf32>
    %17 = arith.addf %10, %16 : vector<8x256xf32>
    %18 = vector.extract_strided_slice %0 {offsets = [0, 0], sizes = [8, 1], strides = [1, 1]} : vector<8x128xf32> to vector<8x1xf32>
    %19 = vector.shape_cast %18 : vector<8x1xf32> to vector<8xf32>
    %20 = vector.shape_cast %19 : vector<8xf32> to vector<8x1xf32>
    %21 = vector.broadcast %20 : vector<8x1xf32> to vector<8x256xf32>
    %22 = arith.mulf %21, %15 : vector<8x256xf32>
    %23 = vector.broadcast %20 : vector<8x1xf32> to vector<8x256xf32>
    %24 = arith.mulf %23, %17 : vector<8x256xf32>
    %25 = vector.extract_strided_slice %0 {offsets = [0, 3], sizes = [8, 1], strides = [1, 1]} : vector<8x128xf32> to vector<8x1xf32>
    %26 = vector.shape_cast %25 : vector<8x1xf32> to vector<8xf32>
    %27 = vector.shape_cast %26 : vector<8xf32> to vector<8x1xf32>
    %28 = vector.broadcast %27 : vector<8x1xf32> to vector<8x256xf32>
    %29 = arith.addf %22, %28 : vector<8x256xf32>
    %30 = vector.broadcast %27 : vector<8x1xf32> to vector<8x256xf32>
    %31 = arith.addf %24, %30 : vector<8x256xf32>
    %32 = vector.extract_strided_slice %0 {offsets = [0, 6], sizes = [8, 1], strides = [1, 1]} : vector<8x128xf32> to vector<8x1xf32>
    %33 = vector.shape_cast %32 : vector<8x1xf32> to vector<8xf32>
    %34 = vector.shape_cast %33 : vector<8xf32> to vector<8x1xf32>
    %35 = math.tanh %29 : vector<8x256xf32>
    %36 = vector.broadcast %34 : vector<8x1xf32> to vector<8x256xf32>
    %37 = arith.mulf %36, %35 : vector<8x256xf32>
    %38 = arith.addf %29, %37 : vector<8x256xf32>
    %39 = math.tanh %31 : vector<8x256xf32>
    %40 = vector.broadcast %34 : vector<8x1xf32> to vector<8x256xf32>
    %41 = arith.mulf %40, %39 : vector<8x256xf32>
    %42 = arith.addf %31, %41 : vector<8x256xf32>
    %43 = vector.extract_strided_slice %0 {offsets = [0, 1], sizes = [8, 1], strides = [1, 1]} : vector<8x128xf32> to vector<8x1xf32>
    %44 = vector.shape_cast %43 : vector<8x1xf32> to vector<8xf32>
    %45 = vector.shape_cast %44 : vector<8xf32> to vector<8x1xf32>
    %46 = vector.broadcast %45 : vector<8x1xf32> to vector<8x256xf32>
    %47 = arith.mulf %46, %15 : vector<8x256xf32>
    %48 = vector.broadcast %45 : vector<8x1xf32> to vector<8x256xf32>
    %49 = arith.mulf %48, %17 : vector<8x256xf32>
    %50 = vector.extract_strided_slice %0 {offsets = [0, 4], sizes = [8, 1], strides = [1, 1]} : vector<8x128xf32> to vector<8x1xf32>
    %51 = vector.shape_cast %50 : vector<8x1xf32> to vector<8xf32>
    %52 = vector.shape_cast %51 : vector<8xf32> to vector<8x1xf32>
    %53 = vector.broadcast %52 : vector<8x1xf32> to vector<8x256xf32>
    %54 = arith.addf %47, %53 : vector<8x256xf32>
    %55 = vector.broadcast %52 : vector<8x1xf32> to vector<8x256xf32>
    %56 = arith.addf %49, %55 : vector<8x256xf32>
    %57 = vector.extract_strided_slice %0 {offsets = [0, 7], sizes = [8, 1], strides = [1, 1]} : vector<8x128xf32> to vector<8x1xf32>
    %58 = vector.shape_cast %57 : vector<8x1xf32> to vector<8xf32>
    %59 = vector.shape_cast %58 : vector<8xf32> to vector<8x1xf32>
    %60 = math.tanh %54 : vector<8x256xf32>
    %61 = vector.broadcast %59 : vector<8x1xf32> to vector<8x256xf32>
    %62 = arith.mulf %61, %60 : vector<8x256xf32>
    %63 = arith.addf %54, %62 : vector<8x256xf32>
    %64 = math.tanh %56 : vector<8x256xf32>
    %65 = vector.broadcast %59 : vector<8x1xf32> to vector<8x256xf32>
    %66 = arith.mulf %65, %64 : vector<8x256xf32>
    %67 = arith.addf %56, %66 : vector<8x256xf32>
    %68 = vector.extract_strided_slice %0 {offsets = [0, 2], sizes = [8, 1], strides = [1, 1]} : vector<8x128xf32> to vector<8x1xf32>
    %69 = vector.shape_cast %68 : vector<8x1xf32> to vector<8xf32>
    %70 = vector.shape_cast %69 : vector<8xf32> to vector<8x1xf32>
    %71 = vector.broadcast %70 : vector<8x1xf32> to vector<8x256xf32>
    %72 = arith.mulf %71, %15 : vector<8x256xf32>
    %73 = vector.broadcast %70 : vector<8x1xf32> to vector<8x256xf32>
    %74 = arith.mulf %73, %17 : vector<8x256xf32>
    %75 = vector.extract_strided_slice %0 {offsets = [0, 5], sizes = [8, 1], strides = [1, 1]} : vector<8x128xf32> to vector<8x1xf32>
    %76 = vector.shape_cast %75 : vector<8x1xf32> to vector<8xf32>
    %77 = vector.shape_cast %76 : vector<8xf32> to vector<8x1xf32>
    %78 = vector.broadcast %77 : vector<8x1xf32> to vector<8x256xf32>
    %79 = arith.addf %72, %78 : vector<8x256xf32>
    %80 = vector.broadcast %77 : vector<8x1xf32> to vector<8x256xf32>
    %81 = arith.addf %74, %80 : vector<8x256xf32>
    %82 = vector.extract_strided_slice %0 {offsets = [0, 8], sizes = [8, 1], strides = [1, 1]} : vector<8x128xf32> to vector<8x1xf32>
    %83 = vector.shape_cast %82 : vector<8x1xf32> to vector<8xf32>
    %84 = vector.shape_cast %83 : vector<8xf32> to vector<8x1xf32>
    %85 = math.tanh %79 : vector<8x256xf32>
    %86 = vector.broadcast %84 : vector<8x1xf32> to vector<8x256xf32>
    %87 = arith.mulf %86, %85 : vector<8x256xf32>
    %88 = arith.addf %79, %87 : vector<8x256xf32>
    %89 = math.tanh %81 : vector<8x256xf32>
    %90 = vector.broadcast %84 : vector<8x1xf32> to vector<8x256xf32>
    %91 = arith.mulf %90, %89 : vector<8x256xf32>
    %92 = arith.addf %81, %91 : vector<8x256xf32>
    %93 = vector.extract_strided_slice %0 {offsets = [0, 9], sizes = [8, 1], strides = [1, 1]} : vector<8x128xf32> to vector<8x1xf32>
    %94 = vector.shape_cast %93 : vector<8x1xf32> to vector<8xf32>
    %95 = vector.shape_cast %94 : vector<8xf32> to vector<8x1xf32>
    %96 = vector.broadcast %95 : vector<8x1xf32> to vector<8x256xf32>
    %97 = arith.mulf %96, %38 : vector<8x256xf32>
    %98 = vector.broadcast %95 : vector<8x1xf32> to vector<8x256xf32>
    %99 = arith.mulf %98, %42 : vector<8x256xf32>
    %100 = vector.extract_strided_slice %0 {offsets = [0, 10], sizes = [8, 1], strides = [1, 1]} : vector<8x128xf32> to vector<8x1xf32>
    %101 = vector.shape_cast %100 : vector<8x1xf32> to vector<8xf32>
    %102 = vector.shape_cast %101 : vector<8xf32> to vector<8x1xf32>
    %103 = vector.broadcast %102 : vector<8x1xf32> to vector<8x256xf32>
    %104 = arith.mulf %103, %63 : vector<8x256xf32>
    %105 = arith.addf %97, %104 : vector<8x256xf32>
    %106 = vector.broadcast %102 : vector<8x1xf32> to vector<8x256xf32>
    %107 = arith.mulf %106, %67 : vector<8x256xf32>
    %108 = arith.addf %99, %107 : vector<8x256xf32>
    %109 = vector.extract_strided_slice %0 {offsets = [0, 11], sizes = [8, 1], strides = [1, 1]} : vector<8x128xf32> to vector<8x1xf32>
    %110 = vector.shape_cast %109 : vector<8x1xf32> to vector<8xf32>
    %111 = vector.shape_cast %110 : vector<8xf32> to vector<8x1xf32>
    %112 = vector.broadcast %111 : vector<8x1xf32> to vector<8x256xf32>
    %113 = arith.mulf %112, %88 : vector<8x256xf32>
    %114 = arith.addf %105, %113 : vector<8x256xf32>
    %115 = vector.broadcast %111 : vector<8x1xf32> to vector<8x256xf32>
    %116 = arith.mulf %115, %92 : vector<8x256xf32>
    %117 = arith.addf %108, %116 : vector<8x256xf32>
    %118 = vector.extract_strided_slice %0 {offsets = [0, 18], sizes = [8, 1], strides = [1, 1]} : vector<8x128xf32> to vector<8x1xf32>
    %119 = vector.shape_cast %118 : vector<8x1xf32> to vector<8xf32>
    %120 = vector.shape_cast %119 : vector<8xf32> to vector<8x1xf32>
    %121 = vector.broadcast %120 : vector<8x1xf32> to vector<8x256xf32>
    %122 = arith.addf %114, %121 : vector<8x256xf32>
    %123 = vector.broadcast %120 : vector<8x1xf32> to vector<8x256xf32>
    %124 = arith.addf %117, %123 : vector<8x256xf32>
    %125 = vector.extract_strided_slice %0 {offsets = [0, 21], sizes = [8, 1], strides = [1, 1]} : vector<8x128xf32> to vector<8x1xf32>
    %126 = vector.shape_cast %125 : vector<8x1xf32> to vector<8xf32>
    %127 = vector.shape_cast %126 : vector<8xf32> to vector<8x1xf32>
    %128 = math.tanh %122 : vector<8x256xf32>
    %129 = vector.broadcast %127 : vector<8x1xf32> to vector<8x256xf32>
    %130 = arith.mulf %129, %128 : vector<8x256xf32>
    %131 = arith.addf %122, %130 : vector<8x256xf32>
    %132 = math.tanh %124 : vector<8x256xf32>
    %133 = vector.broadcast %127 : vector<8x1xf32> to vector<8x256xf32>
    %134 = arith.mulf %133, %132 : vector<8x256xf32>
    %135 = arith.addf %124, %134 : vector<8x256xf32>
    %136 = vector.extract_strided_slice %0 {offsets = [0, 12], sizes = [8, 1], strides = [1, 1]} : vector<8x128xf32> to vector<8x1xf32>
    %137 = vector.shape_cast %136 : vector<8x1xf32> to vector<8xf32>
    %138 = vector.shape_cast %137 : vector<8xf32> to vector<8x1xf32>
    %139 = vector.broadcast %138 : vector<8x1xf32> to vector<8x256xf32>
    %140 = arith.mulf %139, %38 : vector<8x256xf32>
    %141 = vector.broadcast %138 : vector<8x1xf32> to vector<8x256xf32>
    %142 = arith.mulf %141, %42 : vector<8x256xf32>
    %143 = vector.extract_strided_slice %0 {offsets = [0, 13], sizes = [8, 1], strides = [1, 1]} : vector<8x128xf32> to vector<8x1xf32>
    %144 = vector.shape_cast %143 : vector<8x1xf32> to vector<8xf32>
    %145 = vector.shape_cast %144 : vector<8xf32> to vector<8x1xf32>
    %146 = vector.broadcast %145 : vector<8x1xf32> to vector<8x256xf32>
    %147 = arith.mulf %146, %63 : vector<8x256xf32>
    %148 = arith.addf %140, %147 : vector<8x256xf32>
    %149 = vector.broadcast %145 : vector<8x1xf32> to vector<8x256xf32>
    %150 = arith.mulf %149, %67 : vector<8x256xf32>
    %151 = arith.addf %142, %150 : vector<8x256xf32>
    %152 = vector.extract_strided_slice %0 {offsets = [0, 14], sizes = [8, 1], strides = [1, 1]} : vector<8x128xf32> to vector<8x1xf32>
    %153 = vector.shape_cast %152 : vector<8x1xf32> to vector<8xf32>
    %154 = vector.shape_cast %153 : vector<8xf32> to vector<8x1xf32>
    %155 = vector.broadcast %154 : vector<8x1xf32> to vector<8x256xf32>
    %156 = arith.mulf %155, %88 : vector<8x256xf32>
    %157 = arith.addf %148, %156 : vector<8x256xf32>
    %158 = vector.broadcast %154 : vector<8x1xf32> to vector<8x256xf32>
    %159 = arith.mulf %158, %92 : vector<8x256xf32>
    %160 = arith.addf %151, %159 : vector<8x256xf32>
    %161 = vector.extract_strided_slice %0 {offsets = [0, 19], sizes = [8, 1], strides = [1, 1]} : vector<8x128xf32> to vector<8x1xf32>
    %162 = vector.shape_cast %161 : vector<8x1xf32> to vector<8xf32>
    %163 = vector.shape_cast %162 : vector<8xf32> to vector<8x1xf32>
    %164 = vector.broadcast %163 : vector<8x1xf32> to vector<8x256xf32>
    %165 = arith.addf %157, %164 : vector<8x256xf32>
    %166 = vector.broadcast %163 : vector<8x1xf32> to vector<8x256xf32>
    %167 = arith.addf %160, %166 : vector<8x256xf32>
    %168 = vector.extract_strided_slice %0 {offsets = [0, 22], sizes = [8, 1], strides = [1, 1]} : vector<8x128xf32> to vector<8x1xf32>
    %169 = vector.shape_cast %168 : vector<8x1xf32> to vector<8xf32>
    %170 = vector.shape_cast %169 : vector<8xf32> to vector<8x1xf32>
    %171 = math.tanh %165 : vector<8x256xf32>
    %172 = vector.broadcast %170 : vector<8x1xf32> to vector<8x256xf32>
    %173 = arith.mulf %172, %171 : vector<8x256xf32>
    %174 = arith.addf %165, %173 : vector<8x256xf32>
    %175 = math.tanh %167 : vector<8x256xf32>
    %176 = vector.broadcast %170 : vector<8x1xf32> to vector<8x256xf32>
    %177 = arith.mulf %176, %175 : vector<8x256xf32>
    %178 = arith.addf %167, %177 : vector<8x256xf32>
    %179 = vector.extract_strided_slice %0 {offsets = [0, 15], sizes = [8, 1], strides = [1, 1]} : vector<8x128xf32> to vector<8x1xf32>
    %180 = vector.shape_cast %179 : vector<8x1xf32> to vector<8xf32>
    %181 = vector.shape_cast %180 : vector<8xf32> to vector<8x1xf32>
    %182 = vector.broadcast %181 : vector<8x1xf32> to vector<8x256xf32>
    %183 = arith.mulf %182, %38 : vector<8x256xf32>
    %184 = vector.broadcast %181 : vector<8x1xf32> to vector<8x256xf32>
    %185 = arith.mulf %184, %42 : vector<8x256xf32>
    %186 = vector.extract_strided_slice %0 {offsets = [0, 16], sizes = [8, 1], strides = [1, 1]} : vector<8x128xf32> to vector<8x1xf32>
    %187 = vector.shape_cast %186 : vector<8x1xf32> to vector<8xf32>
    %188 = vector.shape_cast %187 : vector<8xf32> to vector<8x1xf32>
    %189 = vector.broadcast %188 : vector<8x1xf32> to vector<8x256xf32>
    %190 = arith.mulf %189, %63 : vector<8x256xf32>
    %191 = arith.addf %183, %190 : vector<8x256xf32>
    %192 = vector.broadcast %188 : vector<8x1xf32> to vector<8x256xf32>
    %193 = arith.mulf %192, %67 : vector<8x256xf32>
    %194 = arith.addf %185, %193 : vector<8x256xf32>
    %195 = vector.extract_strided_slice %0 {offsets = [0, 17], sizes = [8, 1], strides = [1, 1]} : vector<8x128xf32> to vector<8x1xf32>
    %196 = vector.shape_cast %195 : vector<8x1xf32> to vector<8xf32>
    %197 = vector.shape_cast %196 : vector<8xf32> to vector<8x1xf32>
    %198 = vector.broadcast %197 : vector<8x1xf32> to vector<8x256xf32>
    %199 = arith.mulf %198, %88 : vector<8x256xf32>
    %200 = arith.addf %191, %199 : vector<8x256xf32>
    %201 = vector.broadcast %197 : vector<8x1xf32> to vector<8x256xf32>
    %202 = arith.mulf %201, %92 : vector<8x256xf32>
    %203 = arith.addf %194, %202 : vector<8x256xf32>
    %204 = vector.extract_strided_slice %0 {offsets = [0, 20], sizes = [8, 1], strides = [1, 1]} : vector<8x128xf32> to vector<8x1xf32>
    %205 = vector.shape_cast %204 : vector<8x1xf32> to vector<8xf32>
    %206 = vector.shape_cast %205 : vector<8xf32> to vector<8x1xf32>
    %207 = vector.broadcast %206 : vector<8x1xf32> to vector<8x256xf32>
    %208 = arith.addf %200, %207 : vector<8x256xf32>
    %209 = vector.broadcast %206 : vector<8x1xf32> to vector<8x256xf32>
    %210 = arith.addf %203, %209 : vector<8x256xf32>
    %211 = vector.extract_strided_slice %0 {offsets = [0, 23], sizes = [8, 1], strides = [1, 1]} : vector<8x128xf32> to vector<8x1xf32>
    %212 = vector.shape_cast %211 : vector<8x1xf32> to vector<8xf32>
    %213 = vector.shape_cast %212 : vector<8xf32> to vector<8x1xf32>
    %214 = math.tanh %208 : vector<8x256xf32>
    %215 = vector.broadcast %213 : vector<8x1xf32> to vector<8x256xf32>
    %216 = arith.mulf %215, %214 : vector<8x256xf32>
    %217 = arith.addf %208, %216 : vector<8x256xf32>
    %218 = math.tanh %210 : vector<8x256xf32>
    %219 = vector.broadcast %213 : vector<8x1xf32> to vector<8x256xf32>
    %220 = arith.mulf %219, %218 : vector<8x256xf32>
    %221 = arith.addf %210, %220 : vector<8x256xf32>
    %222 = vector.extract_strided_slice %0 {offsets = [0, 24], sizes = [8, 1], strides = [1, 1]} : vector<8x128xf32> to vector<8x1xf32>
    %223 = vector.shape_cast %222 : vector<8x1xf32> to vector<8xf32>
    %224 = vector.shape_cast %223 : vector<8xf32> to vector<8x1xf32>
    %225 = vector.broadcast %224 : vector<8x1xf32> to vector<8x256xf32>
    %226 = arith.mulf %225, %131 : vector<8x256xf32>
    %227 = vector.broadcast %224 : vector<8x1xf32> to vector<8x256xf32>
    %228 = arith.mulf %227, %135 : vector<8x256xf32>
    %229 = vector.extract_strided_slice %0 {offsets = [0, 25], sizes = [8, 1], strides = [1, 1]} : vector<8x128xf32> to vector<8x1xf32>
    %230 = vector.shape_cast %229 : vector<8x1xf32> to vector<8xf32>
    %231 = vector.shape_cast %230 : vector<8xf32> to vector<8x1xf32>
    %232 = vector.broadcast %231 : vector<8x1xf32> to vector<8x256xf32>
    %233 = arith.mulf %232, %174 : vector<8x256xf32>
    %234 = arith.addf %226, %233 : vector<8x256xf32>
    %235 = vector.broadcast %231 : vector<8x1xf32> to vector<8x256xf32>
    %236 = arith.mulf %235, %178 : vector<8x256xf32>
    %237 = arith.addf %228, %236 : vector<8x256xf32>
    %238 = vector.extract_strided_slice %0 {offsets = [0, 26], sizes = [8, 1], strides = [1, 1]} : vector<8x128xf32> to vector<8x1xf32>
    %239 = vector.shape_cast %238 : vector<8x1xf32> to vector<8xf32>
    %240 = vector.shape_cast %239 : vector<8xf32> to vector<8x1xf32>
    %241 = vector.broadcast %240 : vector<8x1xf32> to vector<8x256xf32>
    %242 = arith.mulf %241, %217 : vector<8x256xf32>
    %243 = arith.addf %234, %242 : vector<8x256xf32>
    %244 = vector.broadcast %240 : vector<8x1xf32> to vector<8x256xf32>
    %245 = arith.mulf %244, %221 : vector<8x256xf32>
    %246 = arith.addf %237, %245 : vector<8x256xf32>
    %247 = vector.extract_strided_slice %0 {offsets = [0, 33], sizes = [8, 1], strides = [1, 1]} : vector<8x128xf32> to vector<8x1xf32>
    %248 = vector.shape_cast %247 : vector<8x1xf32> to vector<8xf32>
    %249 = vector.shape_cast %248 : vector<8xf32> to vector<8x1xf32>
    %250 = vector.broadcast %249 : vector<8x1xf32> to vector<8x256xf32>
    %251 = arith.addf %243, %250 : vector<8x256xf32>
    %252 = vector.broadcast %249 : vector<8x1xf32> to vector<8x256xf32>
    %253 = arith.addf %246, %252 : vector<8x256xf32>
    %254 = vector.extract_strided_slice %0 {offsets = [0, 36], sizes = [8, 1], strides = [1, 1]} : vector<8x128xf32> to vector<8x1xf32>
    %255 = vector.shape_cast %254 : vector<8x1xf32> to vector<8xf32>
    %256 = vector.shape_cast %255 : vector<8xf32> to vector<8x1xf32>
    %257 = math.tanh %251 : vector<8x256xf32>
    %258 = vector.broadcast %256 : vector<8x1xf32> to vector<8x256xf32>
    %259 = arith.mulf %258, %257 : vector<8x256xf32>
    %260 = arith.addf %251, %259 : vector<8x256xf32>
    %261 = math.tanh %253 : vector<8x256xf32>
    %262 = vector.broadcast %256 : vector<8x1xf32> to vector<8x256xf32>
    %263 = arith.mulf %262, %261 : vector<8x256xf32>
    %264 = arith.addf %253, %263 : vector<8x256xf32>
    %265 = vector.extract_strided_slice %0 {offsets = [0, 27], sizes = [8, 1], strides = [1, 1]} : vector<8x128xf32> to vector<8x1xf32>
    %266 = vector.shape_cast %265 : vector<8x1xf32> to vector<8xf32>
    %267 = vector.shape_cast %266 : vector<8xf32> to vector<8x1xf32>
    %268 = vector.broadcast %267 : vector<8x1xf32> to vector<8x256xf32>
    %269 = arith.mulf %268, %131 : vector<8x256xf32>
    %270 = vector.broadcast %267 : vector<8x1xf32> to vector<8x256xf32>
    %271 = arith.mulf %270, %135 : vector<8x256xf32>
    %272 = vector.extract_strided_slice %0 {offsets = [0, 28], sizes = [8, 1], strides = [1, 1]} : vector<8x128xf32> to vector<8x1xf32>
    %273 = vector.shape_cast %272 : vector<8x1xf32> to vector<8xf32>
    %274 = vector.shape_cast %273 : vector<8xf32> to vector<8x1xf32>
    %275 = vector.broadcast %274 : vector<8x1xf32> to vector<8x256xf32>
    %276 = arith.mulf %275, %174 : vector<8x256xf32>
    %277 = arith.addf %269, %276 : vector<8x256xf32>
    %278 = vector.broadcast %274 : vector<8x1xf32> to vector<8x256xf32>
    %279 = arith.mulf %278, %178 : vector<8x256xf32>
    %280 = arith.addf %271, %279 : vector<8x256xf32>
    %281 = vector.extract_strided_slice %0 {offsets = [0, 29], sizes = [8, 1], strides = [1, 1]} : vector<8x128xf32> to vector<8x1xf32>
    %282 = vector.shape_cast %281 : vector<8x1xf32> to vector<8xf32>
    %283 = vector.shape_cast %282 : vector<8xf32> to vector<8x1xf32>
    %284 = vector.broadcast %283 : vector<8x1xf32> to vector<8x256xf32>
    %285 = arith.mulf %284, %217 : vector<8x256xf32>
    %286 = arith.addf %277, %285 : vector<8x256xf32>
    %287 = vector.broadcast %283 : vector<8x1xf32> to vector<8x256xf32>
    %288 = arith.mulf %287, %221 : vector<8x256xf32>
    %289 = arith.addf %280, %288 : vector<8x256xf32>
    %290 = vector.extract_strided_slice %0 {offsets = [0, 34], sizes = [8, 1], strides = [1, 1]} : vector<8x128xf32> to vector<8x1xf32>
    %291 = vector.shape_cast %290 : vector<8x1xf32> to vector<8xf32>
    %292 = vector.shape_cast %291 : vector<8xf32> to vector<8x1xf32>
    %293 = vector.broadcast %292 : vector<8x1xf32> to vector<8x256xf32>
    %294 = arith.addf %286, %293 : vector<8x256xf32>
    %295 = vector.broadcast %292 : vector<8x1xf32> to vector<8x256xf32>
    %296 = arith.addf %289, %295 : vector<8x256xf32>
    %297 = vector.extract_strided_slice %0 {offsets = [0, 37], sizes = [8, 1], strides = [1, 1]} : vector<8x128xf32> to vector<8x1xf32>
    %298 = vector.shape_cast %297 : vector<8x1xf32> to vector<8xf32>
    %299 = vector.shape_cast %298 : vector<8xf32> to vector<8x1xf32>
    %300 = math.tanh %294 : vector<8x256xf32>
    %301 = vector.broadcast %299 : vector<8x1xf32> to vector<8x256xf32>
    %302 = arith.mulf %301, %300 : vector<8x256xf32>
    %303 = arith.addf %294, %302 : vector<8x256xf32>
    %304 = math.tanh %296 : vector<8x256xf32>
    %305 = vector.broadcast %299 : vector<8x1xf32> to vector<8x256xf32>
    %306 = arith.mulf %305, %304 : vector<8x256xf32>
    %307 = arith.addf %296, %306 : vector<8x256xf32>
    %308 = vector.extract_strided_slice %0 {offsets = [0, 30], sizes = [8, 1], strides = [1, 1]} : vector<8x128xf32> to vector<8x1xf32>
    %309 = vector.shape_cast %308 : vector<8x1xf32> to vector<8xf32>
    %310 = vector.shape_cast %309 : vector<8xf32> to vector<8x1xf32>
    %311 = vector.broadcast %310 : vector<8x1xf32> to vector<8x256xf32>
    %312 = arith.mulf %311, %131 : vector<8x256xf32>
    %313 = vector.broadcast %310 : vector<8x1xf32> to vector<8x256xf32>
    %314 = arith.mulf %313, %135 : vector<8x256xf32>
    %315 = vector.extract_strided_slice %0 {offsets = [0, 31], sizes = [8, 1], strides = [1, 1]} : vector<8x128xf32> to vector<8x1xf32>
    %316 = vector.shape_cast %315 : vector<8x1xf32> to vector<8xf32>
    %317 = vector.shape_cast %316 : vector<8xf32> to vector<8x1xf32>
    %318 = vector.broadcast %317 : vector<8x1xf32> to vector<8x256xf32>
    %319 = arith.mulf %318, %174 : vector<8x256xf32>
    %320 = arith.addf %312, %319 : vector<8x256xf32>
    %321 = vector.broadcast %317 : vector<8x1xf32> to vector<8x256xf32>
    %322 = arith.mulf %321, %178 : vector<8x256xf32>
    %323 = arith.addf %314, %322 : vector<8x256xf32>
    %324 = vector.extract_strided_slice %0 {offsets = [0, 32], sizes = [8, 1], strides = [1, 1]} : vector<8x128xf32> to vector<8x1xf32>
    %325 = vector.shape_cast %324 : vector<8x1xf32> to vector<8xf32>
    %326 = vector.shape_cast %325 : vector<8xf32> to vector<8x1xf32>
    %327 = vector.broadcast %326 : vector<8x1xf32> to vector<8x256xf32>
    %328 = arith.mulf %327, %217 : vector<8x256xf32>
    %329 = arith.addf %320, %328 : vector<8x256xf32>
    %330 = vector.broadcast %326 : vector<8x1xf32> to vector<8x256xf32>
    %331 = arith.mulf %330, %221 : vector<8x256xf32>
    %332 = arith.addf %323, %331 : vector<8x256xf32>
    %333 = vector.extract_strided_slice %0 {offsets = [0, 35], sizes = [8, 1], strides = [1, 1]} : vector<8x128xf32> to vector<8x1xf32>
    %334 = vector.shape_cast %333 : vector<8x1xf32> to vector<8xf32>
    %335 = vector.shape_cast %334 : vector<8xf32> to vector<8x1xf32>
    %336 = vector.broadcast %335 : vector<8x1xf32> to vector<8x256xf32>
    %337 = arith.addf %329, %336 : vector<8x256xf32>
    %338 = vector.broadcast %335 : vector<8x1xf32> to vector<8x256xf32>
    %339 = arith.addf %332, %338 : vector<8x256xf32>
    %340 = vector.extract_strided_slice %0 {offsets = [0, 38], sizes = [8, 1], strides = [1, 1]} : vector<8x128xf32> to vector<8x1xf32>
    %341 = vector.shape_cast %340 : vector<8x1xf32> to vector<8xf32>
    %342 = vector.shape_cast %341 : vector<8xf32> to vector<8x1xf32>
    %343 = math.tanh %337 : vector<8x256xf32>
    %344 = vector.broadcast %342 : vector<8x1xf32> to vector<8x256xf32>
    %345 = arith.mulf %344, %343 : vector<8x256xf32>
    %346 = arith.addf %337, %345 : vector<8x256xf32>
    %347 = math.tanh %339 : vector<8x256xf32>
    %348 = vector.broadcast %342 : vector<8x1xf32> to vector<8x256xf32>
    %349 = arith.mulf %348, %347 : vector<8x256xf32>
    %350 = arith.addf %339, %349 : vector<8x256xf32>
    %351 = vector.extract_strided_slice %0 {offsets = [0, 39], sizes = [8, 1], strides = [1, 1]} : vector<8x128xf32> to vector<8x1xf32>
    %352 = vector.shape_cast %351 : vector<8x1xf32> to vector<8xf32>
    %353 = vector.shape_cast %352 : vector<8xf32> to vector<8x1xf32>
    %354 = vector.broadcast %353 : vector<8x1xf32> to vector<8x256xf32>
    %355 = arith.mulf %354, %260 : vector<8x256xf32>
    %356 = vector.broadcast %353 : vector<8x1xf32> to vector<8x256xf32>
    %357 = arith.mulf %356, %264 : vector<8x256xf32>
    %358 = vector.extract_strided_slice %0 {offsets = [0, 40], sizes = [8, 1], strides = [1, 1]} : vector<8x128xf32> to vector<8x1xf32>
    %359 = vector.shape_cast %358 : vector<8x1xf32> to vector<8xf32>
    %360 = vector.shape_cast %359 : vector<8xf32> to vector<8x1xf32>
    %361 = vector.broadcast %360 : vector<8x1xf32> to vector<8x256xf32>
    %362 = arith.mulf %361, %303 : vector<8x256xf32>
    %363 = arith.addf %355, %362 : vector<8x256xf32>
    %364 = vector.broadcast %360 : vector<8x1xf32> to vector<8x256xf32>
    %365 = arith.mulf %364, %307 : vector<8x256xf32>
    %366 = arith.addf %357, %365 : vector<8x256xf32>
    %367 = vector.extract_strided_slice %0 {offsets = [0, 41], sizes = [8, 1], strides = [1, 1]} : vector<8x128xf32> to vector<8x1xf32>
    %368 = vector.shape_cast %367 : vector<8x1xf32> to vector<8xf32>
    %369 = vector.shape_cast %368 : vector<8xf32> to vector<8x1xf32>
    %370 = vector.broadcast %369 : vector<8x1xf32> to vector<8x256xf32>
    %371 = arith.mulf %370, %346 : vector<8x256xf32>
    %372 = arith.addf %363, %371 : vector<8x256xf32>
    %373 = vector.broadcast %369 : vector<8x1xf32> to vector<8x256xf32>
    %374 = arith.mulf %373, %350 : vector<8x256xf32>
    %375 = arith.addf %366, %374 : vector<8x256xf32>
    %376 = vector.extract_strided_slice %0 {offsets = [0, 48], sizes = [8, 1], strides = [1, 1]} : vector<8x128xf32> to vector<8x1xf32>
    %377 = vector.shape_cast %376 : vector<8x1xf32> to vector<8xf32>
    %378 = vector.shape_cast %377 : vector<8xf32> to vector<8x1xf32>
    %379 = vector.broadcast %378 : vector<8x1xf32> to vector<8x256xf32>
    %380 = arith.addf %372, %379 : vector<8x256xf32>
    %381 = vector.broadcast %378 : vector<8x1xf32> to vector<8x256xf32>
    %382 = arith.addf %375, %381 : vector<8x256xf32>
    %383 = vector.extract_strided_slice %0 {offsets = [0, 51], sizes = [8, 1], strides = [1, 1]} : vector<8x128xf32> to vector<8x1xf32>
    %384 = vector.shape_cast %383 : vector<8x1xf32> to vector<8xf32>
    %385 = vector.shape_cast %384 : vector<8xf32> to vector<8x1xf32>
    %386 = math.tanh %380 : vector<8x256xf32>
    %387 = vector.broadcast %385 : vector<8x1xf32> to vector<8x256xf32>
    %388 = arith.mulf %387, %386 : vector<8x256xf32>
    %389 = arith.addf %380, %388 : vector<8x256xf32>
    %390 = math.tanh %382 : vector<8x256xf32>
    %391 = vector.broadcast %385 : vector<8x1xf32> to vector<8x256xf32>
    %392 = arith.mulf %391, %390 : vector<8x256xf32>
    %393 = arith.addf %382, %392 : vector<8x256xf32>
    %394 = vector.extract_strided_slice %0 {offsets = [0, 42], sizes = [8, 1], strides = [1, 1]} : vector<8x128xf32> to vector<8x1xf32>
    %395 = vector.shape_cast %394 : vector<8x1xf32> to vector<8xf32>
    %396 = vector.shape_cast %395 : vector<8xf32> to vector<8x1xf32>
    %397 = vector.broadcast %396 : vector<8x1xf32> to vector<8x256xf32>
    %398 = arith.mulf %397, %260 : vector<8x256xf32>
    %399 = vector.broadcast %396 : vector<8x1xf32> to vector<8x256xf32>
    %400 = arith.mulf %399, %264 : vector<8x256xf32>
    %401 = vector.extract_strided_slice %0 {offsets = [0, 43], sizes = [8, 1], strides = [1, 1]} : vector<8x128xf32> to vector<8x1xf32>
    %402 = vector.shape_cast %401 : vector<8x1xf32> to vector<8xf32>
    %403 = vector.shape_cast %402 : vector<8xf32> to vector<8x1xf32>
    %404 = vector.broadcast %403 : vector<8x1xf32> to vector<8x256xf32>
    %405 = arith.mulf %404, %303 : vector<8x256xf32>
    %406 = arith.addf %398, %405 : vector<8x256xf32>
    %407 = vector.broadcast %403 : vector<8x1xf32> to vector<8x256xf32>
    %408 = arith.mulf %407, %307 : vector<8x256xf32>
    %409 = arith.addf %400, %408 : vector<8x256xf32>
    %410 = vector.extract_strided_slice %0 {offsets = [0, 44], sizes = [8, 1], strides = [1, 1]} : vector<8x128xf32> to vector<8x1xf32>
    %411 = vector.shape_cast %410 : vector<8x1xf32> to vector<8xf32>
    %412 = vector.shape_cast %411 : vector<8xf32> to vector<8x1xf32>
    %413 = vector.broadcast %412 : vector<8x1xf32> to vector<8x256xf32>
    %414 = arith.mulf %413, %346 : vector<8x256xf32>
    %415 = arith.addf %406, %414 : vector<8x256xf32>
    %416 = vector.broadcast %412 : vector<8x1xf32> to vector<8x256xf32>
    %417 = arith.mulf %416, %350 : vector<8x256xf32>
    %418 = arith.addf %409, %417 : vector<8x256xf32>
    %419 = vector.extract_strided_slice %0 {offsets = [0, 49], sizes = [8, 1], strides = [1, 1]} : vector<8x128xf32> to vector<8x1xf32>
    %420 = vector.shape_cast %419 : vector<8x1xf32> to vector<8xf32>
    %421 = vector.shape_cast %420 : vector<8xf32> to vector<8x1xf32>
    %422 = vector.broadcast %421 : vector<8x1xf32> to vector<8x256xf32>
    %423 = arith.addf %415, %422 : vector<8x256xf32>
    %424 = vector.broadcast %421 : vector<8x1xf32> to vector<8x256xf32>
    %425 = arith.addf %418, %424 : vector<8x256xf32>
    %426 = vector.extract_strided_slice %0 {offsets = [0, 52], sizes = [8, 1], strides = [1, 1]} : vector<8x128xf32> to vector<8x1xf32>
    %427 = vector.shape_cast %426 : vector<8x1xf32> to vector<8xf32>
    %428 = vector.shape_cast %427 : vector<8xf32> to vector<8x1xf32>
    %429 = math.tanh %423 : vector<8x256xf32>
    %430 = vector.broadcast %428 : vector<8x1xf32> to vector<8x256xf32>
    %431 = arith.mulf %430, %429 : vector<8x256xf32>
    %432 = arith.addf %423, %431 : vector<8x256xf32>
    %433 = math.tanh %425 : vector<8x256xf32>
    %434 = vector.broadcast %428 : vector<8x1xf32> to vector<8x256xf32>
    %435 = arith.mulf %434, %433 : vector<8x256xf32>
    %436 = arith.addf %425, %435 : vector<8x256xf32>
    %437 = vector.extract_strided_slice %0 {offsets = [0, 45], sizes = [8, 1], strides = [1, 1]} : vector<8x128xf32> to vector<8x1xf32>
    %438 = vector.shape_cast %437 : vector<8x1xf32> to vector<8xf32>
    %439 = vector.shape_cast %438 : vector<8xf32> to vector<8x1xf32>
    %440 = vector.broadcast %439 : vector<8x1xf32> to vector<8x256xf32>
    %441 = arith.mulf %440, %260 : vector<8x256xf32>
    %442 = vector.broadcast %439 : vector<8x1xf32> to vector<8x256xf32>
    %443 = arith.mulf %442, %264 : vector<8x256xf32>
    %444 = vector.extract_strided_slice %0 {offsets = [0, 46], sizes = [8, 1], strides = [1, 1]} : vector<8x128xf32> to vector<8x1xf32>
    %445 = vector.shape_cast %444 : vector<8x1xf32> to vector<8xf32>
    %446 = vector.shape_cast %445 : vector<8xf32> to vector<8x1xf32>
    %447 = vector.broadcast %446 : vector<8x1xf32> to vector<8x256xf32>
    %448 = arith.mulf %447, %303 : vector<8x256xf32>
    %449 = arith.addf %441, %448 : vector<8x256xf32>
    %450 = vector.broadcast %446 : vector<8x1xf32> to vector<8x256xf32>
    %451 = arith.mulf %450, %307 : vector<8x256xf32>
    %452 = arith.addf %443, %451 : vector<8x256xf32>
    %453 = vector.extract_strided_slice %0 {offsets = [0, 47], sizes = [8, 1], strides = [1, 1]} : vector<8x128xf32> to vector<8x1xf32>
    %454 = vector.shape_cast %453 : vector<8x1xf32> to vector<8xf32>
    %455 = vector.shape_cast %454 : vector<8xf32> to vector<8x1xf32>
    %456 = vector.broadcast %455 : vector<8x1xf32> to vector<8x256xf32>
    %457 = arith.mulf %456, %346 : vector<8x256xf32>
    %458 = arith.addf %449, %457 : vector<8x256xf32>
    %459 = vector.broadcast %455 : vector<8x1xf32> to vector<8x256xf32>
    %460 = arith.mulf %459, %350 : vector<8x256xf32>
    %461 = arith.addf %452, %460 : vector<8x256xf32>
    %462 = vector.extract_strided_slice %0 {offsets = [0, 50], sizes = [8, 1], strides = [1, 1]} : vector<8x128xf32> to vector<8x1xf32>
    %463 = vector.shape_cast %462 : vector<8x1xf32> to vector<8xf32>
    %464 = vector.shape_cast %463 : vector<8xf32> to vector<8x1xf32>
    %465 = vector.broadcast %464 : vector<8x1xf32> to vector<8x256xf32>
    %466 = arith.addf %458, %465 : vector<8x256xf32>
    %467 = vector.broadcast %464 : vector<8x1xf32> to vector<8x256xf32>
    %468 = arith.addf %461, %467 : vector<8x256xf32>
    %469 = vector.extract_strided_slice %0 {offsets = [0, 53], sizes = [8, 1], strides = [1, 1]} : vector<8x128xf32> to vector<8x1xf32>
    %470 = vector.shape_cast %469 : vector<8x1xf32> to vector<8xf32>
    %471 = vector.shape_cast %470 : vector<8xf32> to vector<8x1xf32>
    %472 = math.tanh %466 : vector<8x256xf32>
    %473 = vector.broadcast %471 : vector<8x1xf32> to vector<8x256xf32>
    %474 = arith.mulf %473, %472 : vector<8x256xf32>
    %475 = arith.addf %466, %474 : vector<8x256xf32>
    %476 = math.tanh %468 : vector<8x256xf32>
    %477 = vector.broadcast %471 : vector<8x1xf32> to vector<8x256xf32>
    %478 = arith.mulf %477, %476 : vector<8x256xf32>
    %479 = arith.addf %468, %478 : vector<8x256xf32>
    %480 = vector.extract_strided_slice %0 {offsets = [0, 54], sizes = [8, 1], strides = [1, 1]} : vector<8x128xf32> to vector<8x1xf32>
    %481 = vector.shape_cast %480 : vector<8x1xf32> to vector<8xf32>
    %482 = vector.shape_cast %481 : vector<8xf32> to vector<8x1xf32>
    %483 = vector.broadcast %482 : vector<8x1xf32> to vector<8x256xf32>
    %484 = arith.mulf %483, %389 : vector<8x256xf32>
    %485 = vector.broadcast %482 : vector<8x1xf32> to vector<8x256xf32>
    %486 = arith.mulf %485, %393 : vector<8x256xf32>
    %487 = vector.extract_strided_slice %0 {offsets = [0, 55], sizes = [8, 1], strides = [1, 1]} : vector<8x128xf32> to vector<8x1xf32>
    %488 = vector.shape_cast %487 : vector<8x1xf32> to vector<8xf32>
    %489 = vector.shape_cast %488 : vector<8xf32> to vector<8x1xf32>
    %490 = vector.broadcast %489 : vector<8x1xf32> to vector<8x256xf32>
    %491 = arith.mulf %490, %432 : vector<8x256xf32>
    %492 = arith.addf %484, %491 : vector<8x256xf32>
    %493 = vector.broadcast %489 : vector<8x1xf32> to vector<8x256xf32>
    %494 = arith.mulf %493, %436 : vector<8x256xf32>
    %495 = arith.addf %486, %494 : vector<8x256xf32>
    %496 = vector.extract_strided_slice %0 {offsets = [0, 56], sizes = [8, 1], strides = [1, 1]} : vector<8x128xf32> to vector<8x1xf32>
    %497 = vector.shape_cast %496 : vector<8x1xf32> to vector<8xf32>
    %498 = vector.shape_cast %497 : vector<8xf32> to vector<8x1xf32>
    %499 = vector.broadcast %498 : vector<8x1xf32> to vector<8x256xf32>
    %500 = arith.mulf %499, %475 : vector<8x256xf32>
    %501 = arith.addf %492, %500 : vector<8x256xf32>
    %502 = vector.broadcast %498 : vector<8x1xf32> to vector<8x256xf32>
    %503 = arith.mulf %502, %479 : vector<8x256xf32>
    %504 = arith.addf %495, %503 : vector<8x256xf32>
    %505 = vector.extract_strided_slice %0 {offsets = [0, 57], sizes = [8, 1], strides = [1, 1]} : vector<8x128xf32> to vector<8x1xf32>
    %506 = vector.shape_cast %505 : vector<8x1xf32> to vector<8xf32>
    %507 = vector.shape_cast %506 : vector<8xf32> to vector<8x1xf32>
    %508 = vector.broadcast %507 : vector<8x1xf32> to vector<8x256xf32>
    %509 = arith.addf %501, %508 : vector<8x256xf32>
    %510 = vector.broadcast %507 : vector<8x1xf32> to vector<8x256xf32>
    %511 = arith.addf %504, %510 : vector<8x256xf32>
    %cst_8 = arith.constant 5.000000e-01 : f32
    %512 = vector.broadcast %cst_8 : f32 to vector<8x256xf32>
    %513 = arith.mulf %512, %511 : vector<8x256xf32>
    %514 = math.tanh %513 : vector<8x256xf32>
    %cst_9 = arith.constant 5.000000e-01 : f32
    %515 = vector.broadcast %cst_9 : f32 to vector<8x256xf32>
    %516 = arith.mulf %515, %509 : vector<8x256xf32>
    %517 = math.tanh %516 : vector<8x256xf32>
    %518 = arith.subf %514, %517 : vector<8x256xf32>
    %519 = math.absf %518 : vector<8x256xf32>
    %cst_10 = arith.constant 5.000000e-01 : f32
    %520 = vector.broadcast %cst_10 : f32 to vector<8x256xf32>
    %521 = arith.mulf %520, %519 : vector<8x256xf32>
    %cst_11 = arith.constant 9.99999971E-10 : f32
    %522 = vector.broadcast %cst_11 : f32 to vector<8x256xf32>
    %523 = arith.maximumf %521, %522 : vector<8x256xf32>
    %c0_12 = arith.constant 0 : index
    %c0_13 = arith.constant 0 : index
    %c0_14 = arith.constant 0 : index
    %524 = vector.load %arg5[%c0_12, %c0_13, %c0_14] : memref<1x8x256xf32, #tpu.memory_space<vmem>>, vector<1x8x256xf32>
    %525 = vector.shape_cast %524 : vector<1x8x256xf32> to vector<8x256xf32>
    %526 = vector.shape_cast %523 : vector<8x256xf32> to vector<1x8x256xf32>
    tpu.vector_store %arg5[%c0_12, %c0_13, %c0_14], %526 {strides = array<i32>} : memref<1x8x256xf32, #tpu.memory_space<vmem>>, vector<1x8x256xf32>,
    return
  }
  func.func @transform_0(%arg0: i32, %arg1: i32) -> (i32, i32, i32) {
    %c0_i32 = arith.constant 0 : i32
    %c0_i32_0 = arith.constant 0 : i32
    return %arg0, %c0_i32, %arg1 : i32, i32, i32
  }
  func.func @transform_1(%arg0: i32, %arg1: i32) -> (i32, i32) {
    %c0_i32 = arith.constant 0 : i32
    %c0_i32_0 = arith.constant 0 : i32
    %c0_i32_1 = arith.constant 0 : i32
    return %c0_i32, %c0_i32_0 : i32, i32
  }
  func.func @transform_2(%arg0: i32, %arg1: i32) -> (i32, i32, i32) {
    %c0_i32 = arith.constant 0 : i32
    %c0_i32_0 = arith.constant 0 : i32
    return %arg0, %c0_i32, %arg1 : i32, i32, i32
  }
  func.func @transform_3(%arg0: i32, %arg1: i32) -> (i32, i32, i32) {
    %c0_i32 = arith.constant 0 : i32
    %c0_i32_0 = arith.constant 0 : i32
    return %arg0, %c0_i32, %arg1 : i32, i32, i32
  }
}

</mosaic_0001>

<bundles_post_ra>
// kernel: tpu_custom_call.1
= control target key start
LH: loop header
LB: loop body
LE: loop exit
PB: predicated region body
PF: predicated region fallthrough
CT: control target
= control target key end

     0   :  { %9 = vsyncpa [#allocation3], 0  ;;  %s2153_s0 = inlined_call_operand.hbm [shape: f32[2,8,256], index: 0, kind: input, shape index: {}]   ;;  %s2154_s1 = inlined_call_operand.hbm [shape: f32[8,128], index: 1, kind: input, shape index: {}]   ;;  %s2155_s2 = inlined_call_operand.hbm [shape: f32[2,8,256], index: 2, kind: output, shape index: {0}]   ;;  %s2156_s3 = inlined_call_operand.hbm [shape: f32[2,8,256], index: 3, kind: output, shape index: {1}]  }
   0x1   :  { %11 = vsyncpa [#allocation3 + $0x1], 0 }
   0x2   :  { %12 = vsyncpa [#allocation6], 0 }
   0x3   :  { %13 = vsyncpa [#allocation4], 0 }
   0x4   :  { %15 = vsyncpa [#allocation4 + $0x1], 0 }
   0x5   :  { %16 = vsyncpa [#allocation9], 0 }
   0x6   :  { %18 = vsyncpa [#allocation9 + $0x1], 0  ;;  %s1675_s12 = smov 0   ;;  %s1677_s13 = smov 0  }
   0x7   :  { %s1679_s14 = smov 0   ;;  %s1681_s15 = smov 0  }
   0x8   :  { %s1683_s16 = smov 0   ;;  %s1685_s17 = smov 0  }
   0x9 LB: > { %s1079_s18 = sadd.s32 4294967295, %s1590_s17   ;;  %s1080_s19 = sadd.s32 4294967294, %s1590_s17   ;;  %s1590_s17 = sphi %s1685_s17, %s24_s17   ;;  %s1586_s16 = sphi %s1683_s16, %s2173_s16   ;;  %s1582_s15 = sphi %s1681_s15, %s2172_s15   ;;  %s1578_s14 = sphi %s1679_s14, %s2171_s14   ;;  %s1574_s13 = sphi %s1677_s13, %s2170_s13   ;;  %s1570_s12 = sphi %s1675_s12, %s2169_s12  }
   0xa   : > { %p58_p0 = scmp.ne.s32.totalorder %s1574_s13, %s1570_s12  ;;  %p1709_p1 = scmp.eq.s32.totalorder %s1079_s18, 0 }
   0xb   : > { %p1713_p2 = scmp.eq.s32.totalorder %s1079_s18, 1  ;;  %p111_p3 = scmp.eq.s32.totalorder %s1080_s19, 1 }
   0xc   : > { %p1719_p4 = por %p1709_p1, %p58_p0  ;;  %p1081_p5 = scmp.ge.s32.totalorder %s1590_s17, 1 }
   0xd   : > { %p1724_p6 = por %p111_p3, %p58_p0  ;;  %p146_p7 = scmp.lt.s32.totalorder %s1590_s17, 3 }
   0xe   : > { %s2160_s22 = scalar_select %p1719_p4, 1, 0 }
   0xf   : > { %s2161_s23 = scalar_select %p1724_p6, 1, 0 }
  0x10   : > { %p1729_p8 = pnand %p1081_p5, %p146_p7  ;;  %s1592_s25 = smov [#allocation5]  }
  0x11   : > { %s159_s26 = sshll.u32 %s1592_s25, 4  ;;  %s36_s28 = sadd.s32 1, %s1586_s16  ;;  %s160_s26 = int_to_ptr.vmem [resolvable:$true] %s159_s26 }
  0x12   : > { %p1131_p10 = pneg %p1729_p8  ;;  %s45_s29 = sadd.s32 1, %s1578_s14 }
  0x13   : > { %p38_p12 = scmp.ge.s32.totalorder %s36_s28, 2  ;;  %s1433_s30 = scalar_lea.vmem %s160_s26, 128 }
  0x14   : > { %p1738_p11 = pnand %p1131_p10, %p1709_p1  ;;  %p1434_p0 = scmp.ne.s32.totalorder %s160_s26, %s1433_s30 }
  0x15   : > { %p1441_p7 = scmp.lt.s32.totalorder %s160_s26, %s160_s26  ;;  %p1442_p6 = scmp.lt.s32.totalorder %s1433_s30, %s1433_s30 }
  0x16   : > { %p1424_p13 = pneg %p1738_p11 }
  0x17   : > { %p1443_p9 = por %p1442_p6, %p1441_p7 }
  0x18   : > { %p1436_p3 = pnand %p1434_p0, %p1424_p13 }
  0x1a   : > { %p1437_p5 = pneg %p1436_p3 }
  0x1c   : > { %p1444_p4 = pnand %p1443_p9, %p1437_p5 }
  0x1e   : > { %1447 = shalt.err (!%p1444_p4)
}
  0x1f   : > { %1134 = dma.hbm_to_vmem [thread:$0]  (!%p1738_p11), %s2154_s1, 128, %s160_s26, [#allocation6]  }
  0x20   : > { %s2175_s28 = smov (%p38_p12, %s36_s28), 0  ;;  %p52_p6 = scmp.ne.s32.totalorder %s1578_s14, %s1574_s13 }
  0x21   : > { %p53_p4 = scmp.eq.s32.totalorder %s1590_s17, 0  ;;  %s40_s6 = ssub.s32 %s1586_s16, %s2175_s28 }
  0x22   : > { %p1147_p9 = scmp.lt.s32.totalorder %s1590_s17, 2  ;;  %p43_p10 = scmp.eq.s32.totalorder %s40_s6, 0 }
  0x23   : > { %p54_p13 = por %p53_p4, %p52_p6  ;;  %p1761_p0 = por %p1713_p2, %p52_p6 }
  0x24   : > { %s170_s8 = sand.u32 1, %s1578_s14   ;;  %s1102_s11 = sshll.u32 %s1586_s16, 8 }
  0x25   : > { %s1767_s9 = scalar_select %p43_p10, %s1578_s14, %s45_s29  }
  0x26   : > { %s1084_s10 = sshll.u32 %s170_s8, 4  ;;  %s182_s25 = scalar_lea.hbm %s2153_s0, %s1102_s11 }
  0x27   : > { %s174_s26 = scalar_lea.vmem [#allocation2], %s1084_s10  ;;  %p1773_p11 = pnand %p1147_p9, %p54_p13 }
  0x28   : > { %s184_s27 = sshll.u32 %s174_s26, 4  ;;  %s171_s21 = scalar_lea.sflag [#allocation3], %s170_s8  ;;  %s185_s27 = int_to_ptr.vmem [resolvable:$true] %s184_s27 }
  0x29   : > { %p1450_p2 = pneg %p1773_p11  ;;  %s1461_s4 = scalar_lea.vmem %s185_s27, 256 }
  0x2a   : > { %p1462_p12 = scmp.ne.s32.totalorder %s185_s27, %s1461_s4  ;;  %s1593_s29 = smov [#allocation2]  }
  0x2b   : > { %s1466_s5 = sshll.u32 %s1593_s29, 4  ;;  %s1467_s5 = int_to_ptr.vmem [resolvable:$false] %s1466_s5 }
  0x2c   : > { %p1464_p3 = pnand %p1462_p12, %p1450_p2  ;;  %s1468_s6 = scalar_lea.vmem %s1467_s5, 512 }
  0x2d   : > { %p1469_p7 = scmp.lt.s32.totalorder %s185_s27, %s1467_s5  ;;  %p1470_p6 = scmp.lt.s32.totalorder %s1468_s6, %s1461_s4 }
  0x2e   : > { %p1465_p5 = pneg %p1464_p3 }
  0x2f   : > { %p1471_p4 = por %p1470_p6, %p1469_p7 }
  0x31   : > { %p1472_p10 = pnand %p1471_p4, %p1465_p5 }
  0x33   : > { %1475 = shalt.err (!%p1472_p10)
}
  0x34   : > { %1138 = dma.hbm_to_vmem [thread:$0]  (!%p1773_p11), %s182_s25, 256, %s185_s27, %s171_s21  }
  0x35   : > { %193 = sbr.rel (%p1729_p8) target bundleno = 420 (0x1a4), region = 28  ;;  %s1784_s8 = sand.u32 (!%p1729_p8), 1, %s1574_s13  }
  0x36   : > { %s1787_s10 = sshll.u32 (!%p1729_p8), %s1784_s8, 4  ;;  %s196_s11 = scalar_lea.sflag (!%p1729_p8), [#allocation3], %s1784_s8 }
  0x37   : > { %s199_s18 = scalar_lea.vmem (!%p1729_p8), [#allocation2], %s1787_s10  ;;  %p2166_p9 = scmp.ne.s32.totalorder (!%p1729_p8), %s2160_s22, 0 }
  0x3a   : > { %1553 = dma.done.wait (%p2166_p9), %s196_s11, 256  }
  0x3b   : > { %1555 = vsyncadd (%p2166_p9), %s196_s11, 4294967040 }
  0x3c   : > { %1557 = dma.done.wait (%p1709_p1), [#allocation6], 128  }
  0x3d   : > { %1559 = vsyncadd (%p1709_p1), [#allocation6], 4294967168  ;;  %v1594_v0 = vmov 3   ;;  %v1595_v1 = vmov 58   ;;  %v1799_v2 = vld [vmem:[#allocation5] sm:$0xff]  ;;  %v1596_v3 = vmov 6  }
  0x3e   : > { %1260 = vset.pattern.permute.xlu1 %v1594_v0  ;;  %1258 = vset.pattern.permute.xlu0 %v1595_v1  ;;  %v1597_v4 = vmov 0   ;;  %v1598_v5 = vmov 1   ;;  %v1599_v6 = vmov 4   ;;  %v1600_v7 = vmov 7   ;;  %v235_v47 = vld [vmem:[%s199_s18] sm:$0xff]  ;;  %v236_v48 = vld [vmem:[%s199_s18 + $0x8] sm:$0xff] }
  0x3f   : > { %263 = vperm.xlu1 %1260, %v1799_v2   ;;  %239 = vperm.xlu0 %1258, %v1799_v2   ;;  %v1601_v8 = vmov 5   ;;  %v1602_v9 = vmov 2   ;;  %v1603_v10 = vmov 10   ;;  %v1604_v11 = vmov 8   ;;  %s1857_s20 = scalar_lea.vmem [#allocation7], %s1787_s10  ;;  %s1103_s22 = sshll.u32 %s1582_s15, 8 }
  0x40   : > { %v1605_v12 = vmov 21   ;;  %v1606_v13 = vmov 9   ;;  %v1607_v14 = vmov 14   ;;  %v1608_v15 = vmov 11   ;;  %s1997_s25 = scalar_lea.hbm %s2155_s2, %s1103_s22  ;;  %s934_s26 = sshll.u32 %s1857_s20, 4  ;;  %s935_s26 = int_to_ptr.vmem [resolvable:$true] %s934_s26 }
  0x41   : > { %v1609_v16 = vmov 17   ;;  %v1610_v17 = vmov 18   ;;  %v1611_v18 = vmov 22   ;;  %v1612_v19 = vmov 12   ;;  %s913_s27 = scalar_lea.sflag [#allocation4], %s1784_s8  ;;  %s1476_s30 = scalar_lea.vmem %s935_s26, 256 }
  0x42   : > { %v1613_v20 = vmov 25   ;;  %v1614_v21 = vmov 13   ;;  %v1615_v22 = vmov 26   ;;  %v1616_v23 = vmov 15   ;;  %p1477_p1 = scmp.ne.s32.totalorder %s935_s26, %s1476_s30  ;;  %s1653_s21 = smov [#allocation7]  }
  0x43   : > { %1261 = vset.pattern.permute.xlu1 %v1596_v3  ;;  %1259 = vset.pattern.permute.xlu0 %v1597_v4  ;;  %v1617_v24 = vmov 31   ;;  %v1618_v25 = vmov 16   ;;  %v1619_v26 = vmov 34   ;;  %v1620_v27 = vmov 19   ;;  %s1480_s4 = sshll.u32 %s1653_s21, 4  ;;  %s1481_s4 = int_to_ptr.vmem [resolvable:$false] %s1480_s4 }
  0x44   : > { %273 = vperm.xlu1 %1261, %v1799_v2   ;;  %255 = vperm.xlu0 %1259, %v1799_v2   ;;  %v1621_v28 = vmov 37   ;;  %v1622_v29 = vmov 20   ;;  %v1623_v30 = vmov 40   ;;  %v1624_v31 = vmov 23   ;;  %p1478_p8 = pnand %p1477_p1, %p1761_p0  ;;  %s1482_s29 = scalar_lea.vmem %s1481_s4, 512 }
  0x45   : > { %v1625_v32 = vmov 41   ;;  %v1626_v33 = vmov 24   ;;  %v1627_v34 = vmov 46   ;;  %v1628_v35 = vmov 27   ;;  %p1483_p11 = scmp.lt.s32.totalorder %s935_s26, %s1481_s4  ;;  %p1484_p2 = scmp.lt.s32.totalorder %s1482_s29, %s1476_s30 }
  0x46   : > { %v1629_v36 = vmov 49   ;;  %v1630_v37 = vmov 28   ;;  %v1631_v38 = vmov 52   ;;  %v1632_v39 = vmov 29   ;;  %p1479_p13 = pneg %p1478_p8 }
  0x47   : > { %v1633_v40 = vmov 55   ;;  %v1634_v41 = vmov 30   ;;  %v1635_v42 = vmov 57   ;;  %v1636_v43 = vmov 32   ;;  %p1485_p12 = por %p1484_p2, %p1483_p11 }
  0x48   : > { %1262 = vset.pattern.permute.xlu1 %v1598_v5  ;;  %1263 = vset.pattern.permute.xlu0 %v1599_v6  ;;  %v1637_v44 = vmov 33   ;;  %v1638_v45 = vmov 35   ;;  %v1639_v46 = vmov 36   ;;  %v1640_v53 = vmov 38  }
  0x49   : > { %287 = vperm.xlu1 %1262, %v1799_v2   ;;  %295 = vperm.xlu0 %1263, %v1799_v2   ;;  %v1641_v63 = vmov 39   ;;  %p1486_p3 = pnand %p1485_p12, %p1479_p13 }
  0x4d   : > { %1264 = vset.pattern.permute.xlu1 %v1600_v7  ;;  %1266 = vset.pattern.permute.xlu0 %v1601_v8  ;;  %v1642_v8 = vmov 42  }
  0x4e   : > { %305 = vperm.xlu1 %1264, %v1799_v2   ;;  %327 = vperm.xlu0 %1266, %v1799_v2  }
  0x52   : > { %1265 = vset.pattern.permute.xlu1 %v1602_v9  ;;  %1269 = vset.pattern.permute.xlu0 %v1603_v10 }
  0x53   : > { %319 = vperm.xlu1 %1265, %v1799_v2   ;;  %359 = vperm.xlu0 %1269, %v1799_v2  }
  0x57   : > { %1267 = vset.pattern.permute.xlu1 %v1604_v11  ;;  %1272 = vset.pattern.permute.xlu0 %v1605_v12 }
  0x58   : > { %337 = vperm.xlu1 %1267, %v1799_v2   ;;  %393 = vperm.xlu0 %1272, %v1799_v2  }
  0x5c   : > { %1268 = vset.pattern.permute.xlu1 %v1606_v13  ;;  %1275 = vset.pattern.permute.xlu0 %v1607_v14 }
  0x5d   : > { %351 = vperm.xlu1 %1268, %v1799_v2   ;;  %427 = vperm.xlu0 %1275, %v1799_v2  }
  0x61   : > { %1270 = vset.pattern.permute.xlu1 %v1608_v15  ;;  %1278 = vset.pattern.permute.xlu0 %v1609_v16 }
  0x62   : > { %371 = vperm.xlu1 %1270, %v1799_v2   ;;  %483 = vperm.xlu0 %1278, %v1799_v2  }
  0x66   : > { %1271 = vset.pattern.permute.xlu1 %v1610_v17  ;;  %1281 = vset.pattern.permute.xlu0 %v1611_v18 }
  0x67   : > { %383 = vperm.xlu1 %1271, %v1799_v2   ;;  %449 = vperm.xlu0 %1281, %v1799_v2  }
  0x6b   : > { %1273 = vset.pattern.permute.xlu1 %v1612_v19  ;;  %1284 = vset.pattern.permute.xlu0 %v1613_v20 }
  0x6c   : > { %407 = vperm.xlu1 %1273, %v1799_v2   ;;  %527 = vperm.xlu0 %1284, %v1799_v2  }
  0x70   : > { %1274 = vset.pattern.permute.xlu1 %v1614_v21  ;;  %1287 = vset.pattern.permute.xlu0 %v1615_v22  ;;  %v1643_v21 = vmov 43  }
  0x71   : > { %415 = vperm.xlu1 %1274, %v1799_v2   ;;  %539 = vperm.xlu0 %1287, %v1799_v2  }
  0x75   : > { %1276 = vset.pattern.permute.xlu1 %v1616_v23  ;;  %1290 = vset.pattern.permute.xlu0 %v1617_v24 }
  0x76   : > { %463 = vperm.xlu1 %1276, %v1799_v2   ;;  %639 = vperm.xlu0 %1290, %v1799_v2  }
  0x7a   : > { %1277 = vset.pattern.permute.xlu1 %v1618_v25  ;;  %1293 = vset.pattern.permute.xlu0 %v1619_v26 }
  0x7b   : > { %471 = vperm.xlu1 %1277, %v1799_v2   ;;  %607 = vperm.xlu0 %1293, %v1799_v2  }
  0x7f   : > { %1279 = vset.pattern.permute.xlu1 %v1620_v27  ;;  %1296 = vset.pattern.permute.xlu0 %v1621_v28 }
  0x80   : > { %439 = vperm.xlu1 %1279, %v1799_v2   ;;  %617 = vperm.xlu0 %1296, %v1799_v2  }
  0x84   : > { %1280 = vset.pattern.permute.xlu1 %v1622_v29  ;;  %1299 = vset.pattern.permute.xlu0 %v1623_v30 }
  0x85   : > { %495 = vperm.xlu1 %1280, %v1799_v2   ;;  %695 = vperm.xlu0 %1299, %v1799_v2  }
  0x89   : > { %1282 = vset.pattern.permute.xlu1 %v1624_v31  ;;  %1302 = vset.pattern.permute.xlu0 %v1625_v32 }
  0x8a   : > { %505 = vperm.xlu1 %1282, %v1799_v2   ;;  %707 = vperm.xlu0 %1302, %v1799_v2  }
  0x8e   : > { %1283 = vset.pattern.permute.xlu1 %v1626_v33  ;;  %1305 = vset.pattern.permute.xlu0 %v1627_v34 }
  0x8f   : > { %519 = vperm.xlu1 %1283, %v1799_v2   ;;  %807 = vperm.xlu0 %1305, %v1799_v2  }
  0x93   : > { %1285 = vset.pattern.permute.xlu1 %v1628_v35  ;;  %1308 = vset.pattern.permute.xlu0 %v1629_v36  ;;  %v1644_v36 = vmov 44  }
  0x94   : > { %575 = vperm.xlu1 %1285, %v1799_v2   ;;  %775 = vperm.xlu0 %1308, %v1799_v2  }
  0x98   : > { %1286 = vset.pattern.permute.xlu1 %v1630_v37  ;;  %1311 = vset.pattern.permute.xlu0 %v1631_v38 }
  0x99   : > { %583 = vperm.xlu1 %1286, %v1799_v2   ;;  %785 = vperm.xlu0 %1311, %v1799_v2  }
  0x9d   : > { %1288 = vset.pattern.permute.xlu1 %v1632_v39  ;;  %1314 = vset.pattern.permute.xlu0 %v1633_v40 }
  0x9e   : > { %595 = vperm.xlu1 %1288, %v1799_v2   ;;  %863 = vperm.xlu0 %1314, %v1799_v2  }
  0xa2   : > { %1289 = vset.pattern.permute.xlu1 %v1634_v41  ;;  %1317 = vset.pattern.permute.xlu0 %v1635_v42 }
  0xa3   : > { %631 = vperm.xlu1 %1289, %v1799_v2  }
  0xa7   : > { %1291 = vset.pattern.permute.xlu1 %v1636_v43 }
  0xa8   : > { %651 = vperm.xlu1 %1291, %v1799_v2  }
  0xac   : > { %1292 = vset.pattern.permute.xlu1 %v1637_v44 }
  0xad   : > { %551 = vperm.xlu1 %1292, %v1799_v2  }
  0xb1   : > { %1294 = vset.pattern.permute.xlu1 %v1638_v45 }
  0xb2   : > { %663 = vperm.xlu1 %1294, %v1799_v2  }
  0xb6   : > { %1295 = vset.pattern.permute.xlu1 %v1639_v46 }
  0xb7   : > { %561 = vperm.xlu1 %1295, %v1799_v2  }
  0xba   : > { %v264_v49 = vpop.permute.xlu1 %263  ;;  %v240_v50 = vpop.permute.xlu0 %239 }
  0xbb   : > { %v242_v51 = vsub.f32 %v235_v47, %v240_v50  ;;  %v243_v52 = vsub.f32 %v236_v48, %v240_v50  ;;  %1297 = vset.pattern.permute.xlu1 %v1640_v53  ;;  %v1645_v47 = vmov 45  }
  0xbc   : > { %673 = vperm.xlu1 %1297, %v1799_v2  }
  0xbd   : > { %v1107_v54 = vcvt.f32.s32 %v242_v51  ;;  %v1105_v55 = vand.u32 2147483647, %v242_v51  ;;  %v1115_v56 = vcvt.f32.s32 %v243_v52  ;;  %v1110_v58 = vand.u32 2147483648, %v242_v51 }
  0xbe   : > { %v1113_v59 = vand.u32 2147483647, %v243_v52  ;;  %v1118_v62 = vand.u32 2147483648, %v243_v52 }
  0xbf   : > { %v1108_v57 = vcvt.s32.f32 %v1107_v54  ;;  %v1852_v60 = vpop.permute.xlu1 %273  ;;  %v1116_v61 = vcvt.s32.f32 %v1115_v56  ;;  %vm1106_vm0 = vcmp.lt.f32.partialorder %v1105_v55, 8388608.0  ;;  %v256_v4 = vpop.permute.xlu0 %255 }
  0xc0   : > { %1298 = vset.pattern.permute.xlu1 %v1641_v63  ;;  %vm1114_vm1 = vcmp.lt.f32.partialorder %v1113_v59, 8388608.0 }
  0xc1   : > { %v1109_v0 = vand.u32 2147483647, %v1108_v57  ;;  %687 = vperm.xlu1 %1298, %v1799_v2   ;;  %v1117_v1 = vand.u32 2147483647, %v1116_v61  ;;  %v1647_v61 = vmov 48  }
  0xc3   : > { %v1111_v3 = vor.u32 %v1110_v58, %v1109_v0  ;;  %v1119_v5 = vor.u32 %v1118_v62, %v1117_v1 }
  0xc4   : > { %v288_v6 = vpop.permute.xlu1 %287  ;;  %v296_v17 = vpop.permute.xlu0 %295 }
  0xc5   : > { %v1112_v7 = vsel %vm1106_vm0, %v1111_v3, %v242_v51  ;;  %1300 = vset.pattern.permute.xlu1 %v1642_v8  ;;  %v1120_v9 = vsel %vm1114_vm1, %v1119_v5, %v243_v52 }
  0xc6   : > { %v246_v10 = vadd.f32 %v1112_v7, %v240_v50  ;;  %743 = vperm.xlu1 %1300, %v1799_v2   ;;  %v247_v11 = vadd.f32 %v1120_v9, %v240_v50  ;;  %v1646_v50 = vmov 47  }
  0xc8   : > { %v1092_v12 = vadd.f32 -0.5, %v246_v10  ;;  %v252_v13 = vadd.f32 0.5, %v246_v10  ;;  %248 = vst [vmem:[%s1857_s20] sm:$0xff] %v246_v10  ;;  %v1093_v14 = vadd.f32 -0.5, %v247_v11  ;;  %v253_v15 = vadd.f32 0.5, %v247_v11  ;;  %249 = vst [vmem:[%s1857_s20 + $0x8] sm:$0xff] %v247_v11 }
  0xc9   : > { %v1860_v16 = vpop.permute.xlu1 %305  ;;  %v328_v37 = vpop.permute.xlu0 %327 }
  0xca   : > { %v290_v18 = vmul.f32 %v1092_v12, %v288_v6  ;;  %v258_v19 = vmul.f32 %v1092_v12, %v256_v4  ;;  %v260_v20 = vmul.f32 %v256_v4, %v252_v13  ;;  %1301 = vset.pattern.permute.xlu1 %v1643_v21  ;;  %v291_v22 = vmul.f32 %v1093_v14, %v288_v6 }
  0xcb   : > { %v259_v23 = vmul.f32 %v1093_v14, %v256_v4  ;;  %v261_v24 = vmul.f32 %v256_v4, %v253_v15  ;;  %751 = vperm.xlu1 %1301, %v1799_v2   ;;  %v292_v25 = vmul.f32 %v288_v6, %v252_v13  ;;  %v293_v28 = vmul.f32 %v288_v6, %v253_v15 }
  0xcc   : > { %v266_v26 = vadd.f32 %v264_v49, %v258_v19  ;;  %v268_v27 = vadd.f32 %v264_v49, %v260_v20  ;;  %v298_v31 = vadd.f32 %v296_v17, %v290_v18  ;;  %v299_v33 = vadd.f32 %v296_v17, %v291_v22 }
  0xcd   : > { %v267_v29 = vadd.f32 %v264_v49, %v259_v23  ;;  %v269_v30 = vadd.f32 %v264_v49, %v261_v24  ;;  %v300_v38 = vadd.f32 %v296_v17, %v292_v25  ;;  %v301_v40 = vadd.f32 %v296_v17, %v293_v28 }
  0xce   : > { %1318 = vtanh.f32 %v266_v26  ;;  %v320_v32 = vpop.permute.xlu1 %319  ;;  %v360_v5 = vpop.permute.xlu0 %359  ;;  %v1648_v18 = vmov 50  }
  0xcf   : > { %1320 = vtanh.f32 %v267_v29  ;;  %v322_v34 = vmul.f32 %v1092_v12, %v320_v32  ;;  %v323_v35 = vmul.f32 %v1093_v14, %v320_v32  ;;  %1303 = vset.pattern.permute.xlu1 %v1644_v36  ;;  %v324_v39 = vmul.f32 %v320_v32, %v252_v13 }
  0xd0   : > { %1322 = vtanh.f32 %v268_v27  ;;  %763 = vperm.xlu1 %1303, %v1799_v2   ;;  %v325_v41 = vmul.f32 %v320_v32, %v253_v15 }
  0xd1   : > { %1324 = vtanh.f32 %v269_v30  ;;  %v1865_v43 = vadd.f32 %v328_v37, %v322_v34  ;;  %v1867_v44 = vadd.f32 %v328_v37, %v323_v35  ;;  %v1871_v46 = vadd.f32 %v328_v37, %v324_v39 }
  0xd2   : > { %1326 = vtanh.f32 %v298_v31  ;;  %v1873_v48 = vadd.f32 %v328_v37, %v325_v41 }
  0xd3   : > { %1328 = vtanh.f32 %v299_v33  ;;  %v1869_v45 = vpop.permute.xlu1 %337 }
  0xd4   : > { %1330 = vtanh.f32 %v300_v38  ;;  %1304 = vset.pattern.permute.xlu1 %v1645_v47 }
  0xd5   : > { %1332 = vtanh.f32 %v301_v40  ;;  %799 = vperm.xlu1 %1304, %v1799_v2  }
  0xd6   : > { %1334 = vtanh.f32 %v1865_v43 }
  0xd7   : > { %1336 = vtanh.f32 %v1867_v44 }
  0xd8   : > { %1338 = vtanh.f32 %v1871_v46  ;;  %v352_v49 = vpop.permute.xlu1 %351 }
  0xd9   : > { %1340 = vtanh.f32 %v1873_v48  ;;  %1306 = vset.pattern.permute.xlu1 %v1646_v50 }
  0xda   : > { %819 = vperm.xlu1 %1306, %v1799_v2  }
  0xdb   : > { %v1319_v51 = vpop.eup %1318 }
  0xdc   : > { %v1321_v52 = vpop.eup %1320  ;;  %v276_v53 = vmul.f32 %v1319_v51, %v1852_v60 }
  0xdd   : > { %v1323_v54 = vpop.eup %1322  ;;  %v277_v55 = vmul.f32 %v1321_v52, %v1852_v60  ;;  %v372_v56 = vpop.permute.xlu1 %371 }
  0xde   : > { %v1325_v57 = vpop.eup %1324  ;;  %v1883_v58 = vadd.f32 %v276_v53, %v266_v26  ;;  %v282_v59 = vmul.f32 %v1323_v54, %v1852_v60  ;;  %1307 = vset.pattern.permute.xlu1 %v1647_v61 }
  0xdf   : > { %v1327_v62 = vpop.eup %1326  ;;  %v1886_v63 = vadd.f32 %v277_v55, %v267_v29  ;;  %v283_v0 = vmul.f32 %v1325_v57, %v1852_v60  ;;  %719 = vperm.xlu1 %1307, %v1799_v2   ;;  %v1650_v57 = vmov 53  }
  0xe0   : > { %v1329_v1 = vpop.eup %1328  ;;  %v1890_v3 = vadd.f32 %v282_v59, %v268_v27  ;;  %v308_v4 = vmul.f32 %v1327_v62, %v1860_v16  ;;  %v354_v60 = vmul.f32 %v352_v49, %v1883_v58 }
  0xe1   : > { %v1331_v6 = vpop.eup %1330  ;;  %v1893_v7 = vadd.f32 %v283_v0, %v269_v30  ;;  %v309_v8 = vmul.f32 %v1329_v1, %v1860_v16  ;;  %v355_v17 = vmul.f32 %v352_v49, %v1886_v63 }
  0xe2   : > { %v1333_v9 = vpop.eup %1332  ;;  %v1896_v10 = vadd.f32 %v308_v4, %v298_v31  ;;  %v314_v11 = vmul.f32 %v1331_v6, %v1860_v16  ;;  %v1900_v12 = vpop.permute.xlu1 %383  ;;  %v356_v22 = vmul.f32 %v352_v49, %v1890_v3 }
  0xe3   : > { %v1335_v13 = vpop.eup %1334  ;;  %v1902_v14 = vadd.f32 %v309_v8, %v299_v33  ;;  %v315_v15 = vmul.f32 %v1333_v9, %v1860_v16  ;;  %1309 = vset.pattern.permute.xlu1 %v1648_v18  ;;  %v357_v26 = vmul.f32 %v352_v49, %v1893_v7  ;;  %v1920_v33 = vpop.permute.xlu0 %393 }
  0xe4   : > { %v1337_v19 = vpop.eup %1336  ;;  %v1906_v20 = vadd.f32 %v314_v11, %v300_v38  ;;  %v340_v21 = vmul.f32 %v1335_v13, %v1869_v45  ;;  %v362_v23 = vmul.f32 %v360_v5, %v1896_v10  ;;  %831 = vperm.xlu1 %1309, %v1799_v2  }
  0xe5   : > { %v1339_v24 = vpop.eup %1338  ;;  %v1912_v25 = vadd.f32 %v315_v15, %v301_v40  ;;  %v341_v16 = vmul.f32 %v1337_v19, %v1869_v45  ;;  %v363_v27 = vmul.f32 %v360_v5, %v1902_v14 }
  0xe6   : > { %v1341_v28 = vpop.eup %1340  ;;  %v342_v29 = vadd.f32 %v340_v21, %v1865_v43  ;;  %v346_v30 = vmul.f32 %v1339_v24, %v1869_v45  ;;  %v364_v31 = vadd.f32 %v362_v23, %v354_v60  ;;  %v366_v32 = vmul.f32 %v360_v5, %v1906_v20 }
  0xe7   : > { %v1923_v34 = vadd.f32 %v341_v16, %v1867_v44  ;;  %v347_v35 = vmul.f32 %v1341_v28, %v1869_v45  ;;  %v365_v36 = vadd.f32 %v363_v27, %v355_v17  ;;  %v367_v37 = vmul.f32 %v360_v5, %v1912_v25  ;;  %v408_v38 = vpop.permute.xlu1 %407  ;;  %v428_v53 = vpop.permute.xlu0 %427 }
  0xe8   : > { %v1928_v39 = vadd.f32 %v346_v30, %v1871_v46  ;;  %v368_v40 = vadd.f32 %v366_v32, %v356_v22  ;;  %v374_v41 = vmul.f32 %v372_v56, %v342_v29  ;;  %v1649_v43 = vmov 51  }
  0xe9   : > { %1310 = vset.pattern.permute.xlu1 %v1649_v43  ;;  %v349_v47 = vadd.f32 %v347_v35, %v1873_v48  ;;  %v369_v49 = vadd.f32 %v367_v37, %v357_v26  ;;  %v375_v50 = vmul.f32 %v372_v56, %v1923_v34  ;;  %v430_v59 = vmul.f32 %v428_v53, %v342_v29 }
  0xea   : > { %729 = vperm.xlu1 %1310, %v1799_v2   ;;  %v378_v44 = vmul.f32 %v372_v56, %v1928_v39  ;;  %v376_v45 = vadd.f32 %v374_v41, %v364_v31  ;;  %v410_v48 = vmul.f32 %v408_v38, %v1883_v58  ;;  %v411_v62 = vmul.f32 %v408_v38, %v1886_v63 }
  0xeb   : > { %v379_v51 = vmul.f32 %v372_v56, %v349_v47  ;;  %v377_v52 = vadd.f32 %v375_v50, %v365_v36  ;;  %v412_v1 = vmul.f32 %v408_v38, %v1890_v3  ;;  %v413_v4 = vmul.f32 %v408_v38, %v1893_v7  ;;  %v484_v18 = vpop.permute.xlu0 %483 }
  0xec   : > { %v380_v54 = vadd.f32 %v378_v44, %v368_v40  ;;  %v416_v46 = vpop.permute.xlu1 %415  ;;  %v1935_v61 = vadd.f32 %v1900_v12, %v376_v45  ;;  %v431_v8 = vmul.f32 %v428_v53, %v1923_v34  ;;  %v434_v15 = vmul.f32 %v428_v53, %v1928_v39 }
  0xed   : > { %v381_v55 = vadd.f32 %v379_v51, %v369_v49  ;;  %v418_v0 = vmul.f32 %v416_v46, %v1896_v10  ;;  %v419_v56 = vmul.f32 %v416_v46, %v1902_v14  ;;  %v422_v5 = vmul.f32 %v416_v46, %v1906_v20 }
  0xee   : > { %1312 = vset.pattern.permute.xlu1 %v1650_v57  ;;  %v423_v6 = vmul.f32 %v416_v46, %v1912_v25  ;;  %v1948_v9 = vadd.f32 %v1900_v12, %v377_v52  ;;  %v435_v17 = vmul.f32 %v428_v53, %v349_v47  ;;  %v1651_v22 = vmov 54  }
  0xef   : > { %841 = vperm.xlu1 %1312, %v1799_v2   ;;  %v420_v11 = vadd.f32 %v418_v0, %v410_v48  ;;  %v421_v60 = vadd.f32 %v419_v56, %v411_v62  ;;  %v424_v19 = vadd.f32 %v422_v5, %v412_v1  ;;  %v1953_v16 = vadd.f32 %v1900_v12, %v380_v54 }
  0xf0   : > { %v425_v21 = vadd.f32 %v423_v6, %v413_v4  ;;  %1342 = vtanh.f32 %v1935_v61  ;;  %v1957_v28 = vadd.f32 %v1900_v12, %v381_v55  ;;  %v486_v30 = vmul.f32 %v484_v18, %v342_v29 }
  0xf1   : > { %v464_v13 = vpop.permute.xlu1 %463  ;;  %v432_v23 = vadd.f32 %v430_v59, %v420_v11  ;;  %v433_v24 = vadd.f32 %v431_v8, %v421_v60  ;;  %v436_v26 = vadd.f32 %v434_v15, %v424_v19  ;;  %1344 = vtanh.f32 %v1948_v9 }
  0xf2   : > { %v437_v27 = vadd.f32 %v435_v17, %v425_v21  ;;  %v466_v31 = vmul.f32 %v464_v13, %v1883_v58  ;;  %v467_v32 = vmul.f32 %v464_v13, %v1886_v63  ;;  %v468_v35 = vmul.f32 %v464_v13, %v1890_v3 }
  0xf3   : > { %1313 = vset.pattern.permute.xlu1 %v1651_v22  ;;  %v469_v36 = vmul.f32 %v464_v13, %v1893_v7  ;;  %v1652_v43 = vmov 56   ;;  %1346 = vtanh.f32 %v1953_v16  ;;  %v487_v58 = vmul.f32 %v484_v18, %v1923_v34 }
  0xf4   : > { %855 = vperm.xlu1 %1313, %v1799_v2   ;;  %v490_v63 = vmul.f32 %v484_v18, %v1928_v39  ;;  %v491_v3 = vmul.f32 %v484_v18, %v349_v47  ;;  %1348 = vtanh.f32 %v1957_v28 }
  0xf6   : > { %v472_v37 = vpop.permute.xlu1 %471 }
  0xf7   : > { %v474_v38 = vmul.f32 %v472_v37, %v1896_v10  ;;  %v475_v40 = vmul.f32 %v472_v37, %v1902_v14  ;;  %v478_v41 = vmul.f32 %v472_v37, %v1906_v20  ;;  %v479_v12 = vmul.f32 %v472_v37, %v1912_v25 }
  0xf8   : > { %1315 = vset.pattern.permute.xlu1 %v1652_v43 }
  0xf9   : > { %875 = vperm.xlu1 %1315, %v1799_v2   ;;  %v476_v7 = vadd.f32 %v474_v38, %v466_v31  ;;  %v477_v29 = vadd.f32 %v475_v40, %v467_v32  ;;  %v480_v10 = vadd.f32 %v478_v41, %v468_v35  ;;  %v481_v49 = vadd.f32 %v479_v12, %v469_v36 }
  0xfb   : > { %v440_v14 = vpop.permute.xlu1 %439  ;;  %v488_v20 = vadd.f32 %v486_v30, %v476_v7  ;;  %v489_v25 = vadd.f32 %v487_v58, %v477_v29  ;;  %v492_v50 = vadd.f32 %v490_v63, %v480_v10  ;;  %v493_v44 = vadd.f32 %v491_v3, %v481_v49 }
  0xfc   : > { %v1973_v45 = vadd.f32 %v440_v14, %v432_v23  ;;  %v1975_v34 = vadd.f32 %v440_v14, %v433_v24  ;;  %v1977_v39 = vadd.f32 %v440_v14, %v436_v26  ;;  %v1980_v47 = vadd.f32 %v440_v14, %v437_v27 }
  0xfd   : > { %1316 = vset.pattern.permute.xlu1 %v1635_v42  ;;  %v1343_v52 = vpop.eup %1342 }
  0xfe   : > { %887 = vperm.xlu1 %1316, %v1799_v2   ;;  %1350 = vtanh.f32 %v1973_v45  ;;  %v1345_v2 = vpop.eup %1344 }
  0xff   : > { %1352 = vtanh.f32 %v1975_v34 }
 0x100   : > { %1354 = vtanh.f32 %v1977_v39  ;;  %v496_v51 = vpop.permute.xlu1 %495 }
 0x101   : > { %1356 = vtanh.f32 %v1980_v47  ;;  %v1988_v53 = vadd.f32 %v496_v51, %v488_v20  ;;  %v1990_v42 = vadd.f32 %v496_v51, %v489_v25  ;;  %v2000_v54 = vadd.f32 %v496_v51, %v492_v50 }
 0x102   : > { %v2002_v46 = vadd.f32 %v496_v51, %v493_v44 }
 0x103   : > { %1358 = vtanh.f32 %v1988_v53 }
 0x104   : > { %1489 = shalt.err (!%p1486_p3)
}
 0x105   : > { %s1490_s5 = scalar_lea.hbm %s1997_s25, 256  ;;  %s1494_s18 = scalar_lea.hbm %s2155_s2, 512 }
 0x106   : > { %p1491_p5 = scmp.ne.s32.totalorder %s1997_s25, %s1490_s5  ;;  %p1495_p4 = scmp.lt.s32.totalorder %s1997_s25, %s2155_s2 }
 0x107   : > { %p1496_p10 = scmp.lt.s32.totalorder %s1494_s18, %s1490_s5 }
 0x108   : > { %p1492_p7 = pnand %p1491_p5, %p1761_p0 }
 0x109   : > { %p1497_p9 = por %p1496_p10, %p1495_p4 }
 0x10a   : > { %p1493_p6 = pneg %p1492_p7 }
 0x10c   : > { %p1498_p1 = pnand %p1497_p9, %p1493_p6 }
 0x10e   : > { %1501 = shalt.err (!%p1498_p1)
}
 0x10f   : > { %1127 = dma.vmem_to_hbm [thread:$0]  (%p1761_p0), %s935_s26, 256, %s1997_s25, %s913_s27   ;;  %1360 = vtanh.f32 %v1990_v42  ;;  %v1347_v55 = vpop.eup %1346  ;;  %v450_v57 = vpop.permute.xlu0 %449  ;;  %v396_v62 = vmul.f32 %v1343_v52, %v1920_v33  ;;  %v397_v0 = vmul.f32 %v1345_v2, %v1920_v33 }
 0x110   : > { %1362 = vtanh.f32 %v2000_v54  ;;  %v506_v59 = vpop.permute.xlu1 %505  ;;  %v1349_v48 = vpop.eup %1348  ;;  %v402_v4 = vmul.f32 %v1347_v55, %v1920_v33  ;;  %s230_s19 = scalar_lea.vmem [#allocation8], %s1787_s10  ;;  %s948_s30 = scalar_lea.hbm %s2156_s3, %s1103_s22 }
 0x111   : > { %1364 = vtanh.f32 %v2002_v46  ;;  %v1351_v1 = vpop.eup %1350  ;;  %v403_v5 = vmul.f32 %v1349_v48, %v1920_v33  ;;  %v2030_v17 = vadd.f32 %v396_v62, %v1935_v61  ;;  %v2033_v18 = vadd.f32 %v397_v0, %v1948_v9  ;;  %s950_s25 = sshll.u32 %s230_s19, 4  ;;  %s918_s21 = scalar_lea.sflag [#allocation9], %s1784_s8  ;;  %s951_s25 = int_to_ptr.vmem [resolvable:$true] %s950_s25 }
 0x112   : > { %v1353_v8 = vpop.eup %1352  ;;  %v452_v11 = vmul.f32 %v1351_v1, %v450_v57  ;;  %v2039_v22 = vadd.f32 %v402_v4, %v1953_v16  ;;  %s1502_s4 = scalar_lea.vmem %s951_s25, 256  ;;  %s1654_s29 = smov [#allocation8]  }
 0x113   : > { %v528_v6 = vpop.permute.xlu0 %527  ;;  %v1355_v60 = vpop.eup %1354  ;;  %v453_v13 = vmul.f32 %v1353_v8, %v450_v57  ;;  %v2042_v33 = vadd.f32 %v403_v5, %v1957_v28  ;;  %p1503_p8 = scmp.ne.s32.totalorder %s951_s25, %s1502_s4  ;;  %s1506_s10 = sshll.u32 %s1654_s29, 4  ;;  %s1507_s10 = int_to_ptr.vmem [resolvable:$false] %s1506_s10 }
 0x114   : > { %v520_v56 = vpop.permute.xlu1 %519  ;;  %v1357_v15 = vpop.eup %1356  ;;  %v2036_v19 = vadd.f32 %v452_v11, %v1973_v45  ;;  %v458_v21 = vmul.f32 %v1355_v60, %v450_v57  ;;  %s1508_s5 = scalar_lea.vmem %s1507_s10, 512  ;;  %p1509_p2 = scmp.lt.s32.totalorder %s951_s25, %s1507_s10 }
 0x115   : > { %v2045_v23 = vadd.f32 %v453_v13, %v1975_v34  ;;  %v459_v24 = vmul.f32 %v1357_v15, %v450_v57  ;;  %v1359_v61 = vpop.eup %1358  ;;  %v522_v30 = vmul.f32 %v520_v56, %v2030_v17  ;;  %v523_v31 = vmul.f32 %v520_v56, %v2033_v18  ;;  %p1504_p13 = pnand %p1503_p8, %p1761_p0  ;;  %p1510_p12 = scmp.lt.s32.totalorder %s1508_s5, %s1502_s4 }
 0x116   : > { %v460_v27 = vadd.f32 %v458_v21, %v1977_v39  ;;  %v530_v9 = vmul.f32 %v528_v6, %v2036_v19  ;;  %v508_v35 = vmul.f32 %v1359_v61, %v506_v59  ;;  %v524_v36 = vmul.f32 %v520_v56, %v2039_v22 }
 0x117   : > { %v461_v16 = vadd.f32 %v459_v24, %v1980_v47  ;;  %v531_v28 = vmul.f32 %v528_v6, %v2045_v23  ;;  %v540_v37 = vpop.permute.xlu0 %539  ;;  %v525_v12 = vmul.f32 %v520_v56, %v2042_v33  ;;  %p1505_p11 = pneg %p1504_p13  ;;  %p1511_p3 = por %p1510_p12, %p1509_p2 }
 0x118   : > { %v576_v26 = vpop.permute.xlu1 %575  ;;  %v534_v41 = vmul.f32 %v528_v6, %v460_v27  ;;  %v532_v43 = vadd.f32 %v530_v9, %v522_v30  ;;  %v510_v63 = vadd.f32 %v508_v35, %v1988_v53 }
 0x119   : > { %v535_v7 = vmul.f32 %v528_v6, %v461_v16  ;;  %v533_v29 = vadd.f32 %v531_v28, %v523_v31  ;;  %v578_v20 = vmul.f32 %v576_v26, %v2030_v17  ;;  %v579_v34 = vmul.f32 %v576_v26, %v2033_v18  ;;  %p1512_p5 = pnand %p1511_p3, %p1505_p11 }
 0x11a   : > { %v536_v14 = vadd.f32 %v534_v41, %v524_v36  ;;  %v542_v45 = vmul.f32 %v540_v37, %v510_v63  ;;  %v580_v51 = vmul.f32 %v576_v26, %v2039_v22  ;;  %v581_v52 = vmul.f32 %v576_v26, %v2042_v33 }
 0x11b   : > { %v537_v44 = vadd.f32 %v535_v7, %v525_v12 }
 0x11c   : > { %v1361_v32 = vpop.eup %1360  ;;  %v584_v25 = vpop.permute.xlu1 %583  ;;  %v544_v48 = vadd.f32 %v542_v45, %v532_v43 }
 0x11d   : > { %v1363_v38 = vpop.eup %1362  ;;  %v509_v40 = vmul.f32 %v1361_v32, %v506_v59  ;;  %v586_v2 = vmul.f32 %v584_v25, %v2036_v19  ;;  %v587_v55 = vmul.f32 %v584_v25, %v2045_v23  ;;  %v590_v57 = vmul.f32 %v584_v25, %v460_v27 }
 0x11e   : > { %v1365_v58 = vpop.eup %1364  ;;  %v514_v3 = vmul.f32 %v1363_v38, %v506_v59 }
 0x11f   : > { %v511_v10 = vadd.f32 %v509_v40, %v1990_v42  ;;  %v515_v49 = vmul.f32 %v1365_v58, %v506_v59  ;;  %v640_v42 = vpop.permute.xlu0 %639  ;;  %v588_v0 = vadd.f32 %v586_v2, %v578_v20  ;;  %v589_v56 = vadd.f32 %v587_v55, %v579_v34 }
 0x120   : > { %v516_v50 = vadd.f32 %v514_v3, %v2000_v54  ;;  %v591_v54 = vmul.f32 %v584_v25, %v461_v16  ;;  %v592_v1 = vadd.f32 %v590_v57, %v580_v51  ;;  %v642_v9 = vmul.f32 %v640_v42, %v2036_v19 }
 0x121   : > { %v517_v39 = vadd.f32 %v515_v49, %v2002_v46  ;;  %v543_v47 = vmul.f32 %v540_v37, %v511_v10  ;;  %v596_v46 = vpop.permute.xlu1 %595  ;;  %v643_v30 = vmul.f32 %v640_v42, %v2045_v23  ;;  %v646_v31 = vmul.f32 %v640_v42, %v460_v27 }
 0x122   : > { %v546_v53 = vmul.f32 %v540_v37, %v516_v50  ;;  %v593_v5 = vadd.f32 %v591_v54, %v581_v52  ;;  %v598_v6 = vmul.f32 %v596_v46, %v510_v63  ;;  %v599_v8 = vmul.f32 %v596_v46, %v511_v10 }
 0x123   : > { %v547_v59 = vmul.f32 %v540_v37, %v517_v39  ;;  %v545_v62 = vadd.f32 %v543_v47, %v533_v29  ;;  %v602_v11 = vmul.f32 %v596_v46, %v516_v50  ;;  %v603_v60 = vmul.f32 %v596_v46, %v517_v39  ;;  %v608_v13 = vpop.permute.xlu0 %607 }
 0x124   : > { %v548_v4 = vadd.f32 %v546_v53, %v536_v14  ;;  %v600_v21 = vadd.f32 %v598_v6, %v588_v0  ;;  %v601_v24 = vadd.f32 %v599_v8, %v589_v56  ;;  %v647_v40 = vmul.f32 %v640_v42, %v461_v16 }
 0x125   : > { %v549_v15 = vadd.f32 %v547_v59, %v537_v44  ;;  %v604_v26 = vadd.f32 %v602_v11, %v592_v1  ;;  %v605_v61 = vadd.f32 %v603_v60, %v593_v5  ;;  %v632_v35 = vpop.permute.xlu1 %631 }
 0x126   : > { %v610_v32 = vadd.f32 %v608_v13, %v600_v21  ;;  %v611_v28 = vadd.f32 %v608_v13, %v601_v24  ;;  %v634_v36 = vmul.f32 %v632_v35, %v2030_v17  ;;  %v635_v37 = vmul.f32 %v632_v35, %v2033_v18 }
 0x127   : > { %v636_v38 = vmul.f32 %v632_v35, %v2039_v22  ;;  %v637_v41 = vmul.f32 %v632_v35, %v2042_v33  ;;  %v612_v12 = vadd.f32 %v608_v13, %v604_v26  ;;  %v613_v23 = vadd.f32 %v608_v13, %v605_v61  ;;  %v618_v2 = vpop.permute.xlu0 %617 }
 0x128   : > { %v644_v43 = vadd.f32 %v642_v9, %v634_v36  ;;  %v645_v58 = vadd.f32 %v643_v30, %v635_v37  ;;  %1366 = vtanh.f32 %v610_v32 }
 0x129   : > { %v648_v3 = vadd.f32 %v646_v31, %v636_v38  ;;  %v649_v19 = vadd.f32 %v647_v40, %v637_v41  ;;  %1368 = vtanh.f32 %v611_v28  ;;  %v652_v27 = vpop.permute.xlu1 %651 }
 0x12a   : > { %v654_v7 = vmul.f32 %v652_v27, %v510_v63  ;;  %v655_v29 = vmul.f32 %v652_v27, %v511_v10  ;;  %v658_v49 = vmul.f32 %v652_v27, %v516_v50  ;;  %v659_v17 = vmul.f32 %v652_v27, %v517_v39 }
 0x12b   : > { %1370 = vtanh.f32 %v612_v12 }
 0x12c   : > { %v656_v18 = vadd.f32 %v654_v7, %v644_v43  ;;  %v657_v14 = vadd.f32 %v655_v29, %v645_v58  ;;  %v660_v22 = vadd.f32 %v658_v49, %v648_v3  ;;  %v661_v16 = vadd.f32 %v659_v17, %v649_v19 }
 0x12d   : > { %1372 = vtanh.f32 %v613_v23  ;;  %v552_v33 = vpop.permute.xlu1 %551 }
 0x12e   : > { %v554_v20 = vadd.f32 %v552_v33, %v544_v48  ;;  %v555_v25 = vadd.f32 %v552_v33, %v545_v62  ;;  %v556_v44 = vadd.f32 %v552_v33, %v548_v4  ;;  %v557_v45 = vadd.f32 %v552_v33, %v549_v15  ;;  %v696_v15 = vpop.permute.xlu0 %695 }
 0x130   : > { %1374 = vtanh.f32 %v554_v20 }
 0x131   : > { %1376 = vtanh.f32 %v555_v25  ;;  %v664_v34 = vpop.permute.xlu1 %663 }
 0x132   : > { %1378 = vtanh.f32 %v556_v44  ;;  %v666_v63 = vadd.f32 %v664_v34, %v656_v18  ;;  %v667_v10 = vadd.f32 %v664_v34, %v657_v14  ;;  %v668_v39 = vadd.f32 %v664_v34, %v660_v22  ;;  %v708_v14 = vpop.permute.xlu0 %707 }
 0x133   : > { %1380 = vtanh.f32 %v557_v45  ;;  %v669_v47 = vadd.f32 %v664_v34, %v661_v16 }
 0x134   : > { %1382 = vtanh.f32 %v666_v63 }
 0x135   : > { %v1367_v50 = vpop.eup %1366  ;;  %1384 = vtanh.f32 %v667_v10  ;;  %v562_v53 = vpop.permute.xlu1 %561 }
 0x136   : > { %v1369_v51 = vpop.eup %1368  ;;  %1386 = vtanh.f32 %v668_v39  ;;  %v620_v55 = vmul.f32 %v1367_v50, %v618_v2 }
 0x137   : > { %1388 = vtanh.f32 %v669_v47  ;;  %v621_v57 = vmul.f32 %v1369_v51, %v618_v2 }
 0x138   : > { %v1371_v52 = vpop.eup %1370  ;;  %v2071_v56 = vadd.f32 %v620_v55, %v610_v32 }
 0x139   : > { %v626_v59 = vmul.f32 %v1371_v52, %v618_v2  ;;  %v674_v48 = vpop.permute.xlu1 %673  ;;  %v2073_v1 = vadd.f32 %v621_v57, %v611_v28 }
 0x13a   : > { %v1373_v42 = vpop.eup %1372  ;;  %v698_v9 = vmul.f32 %v696_v15, %v2071_v56 }
 0x13b   : > { %v627_v54 = vmul.f32 %v1373_v42, %v618_v2  ;;  %v2075_v5 = vadd.f32 %v626_v59, %v612_v12  ;;  %v699_v30 = vmul.f32 %v696_v15, %v2073_v1  ;;  %v808_v59 = vpop.permute.xlu0 %807 }
 0x13d   : > { %v1375_v62 = vpop.eup %1374  ;;  %v2077_v11 = vadd.f32 %v627_v54, %v613_v23  ;;  %v688_v26 = vpop.permute.xlu1 %687  ;;  %v702_v28 = vmul.f32 %v696_v15, %v2075_v5 }
 0x13e   : > { %v1377_v0 = vpop.eup %1376  ;;  %v564_v46 = vmul.f32 %v1375_v62, %v562_v53 }
 0x13f   : > { %v1379_v4 = vpop.eup %1378  ;;  %v565_v6 = vmul.f32 %v1377_v0, %v562_v53  ;;  %v703_v41 = vmul.f32 %v696_v15, %v2077_v11  ;;  %v776_v15 = vpop.permute.xlu0 %775 }
 0x140   : > { %v1381_v8 = vpop.eup %1380  ;;  %v2079_v60 = vadd.f32 %v564_v46, %v554_v20  ;;  %v570_v13 = vmul.f32 %v1379_v4, %v562_v53 }
 0x141   : > { %v2081_v21 = vadd.f32 %v565_v6, %v555_v25  ;;  %v571_v24 = vmul.f32 %v1381_v8, %v562_v53  ;;  %v1383_v61 = vpop.eup %1382  ;;  %v744_v18 = vpop.permute.xlu1 %743 }
 0x142   : > { %v2085_v31 = vadd.f32 %v570_v13, %v556_v44  ;;  %v690_v32 = vmul.f32 %v688_v26, %v2079_v60  ;;  %v1385_v35 = vpop.eup %1384  ;;  %v676_v37 = vmul.f32 %v1383_v61, %v674_v48 }
 0x143   : > { %v573_v36 = vadd.f32 %v571_v24, %v557_v45  ;;  %v691_v38 = vmul.f32 %v688_v26, %v2081_v21  ;;  %v1387_v40 = vpop.eup %1386  ;;  %v677_v12 = vmul.f32 %v1385_v35, %v674_v48  ;;  %v746_v45 = vmul.f32 %v744_v18, %v2079_v60 }
 0x144   : > { %v692_v43 = vmul.f32 %v688_v26, %v2085_v31  ;;  %v700_v58 = vadd.f32 %v698_v9, %v690_v32  ;;  %v1389_v3 = vpop.eup %1388  ;;  %v2092_v19 = vadd.f32 %v676_v37, %v666_v63  ;;  %v682_v23 = vmul.f32 %v1387_v40, %v674_v48 }
 0x145   : > { %v693_v27 = vmul.f32 %v688_v26, %v573_v36  ;;  %v701_v7 = vadd.f32 %v699_v30, %v691_v38  ;;  %v679_v29 = vadd.f32 %v677_v12, %v667_v10  ;;  %v683_v49 = vmul.f32 %v1389_v3, %v674_v48 }
 0x146   : > { %v704_v17 = vadd.f32 %v702_v28, %v692_v43  ;;  %v684_v22 = vadd.f32 %v682_v23, %v668_v39  ;;  %v710_v20 = vmul.f32 %v708_v14, %v2092_v19  ;;  %v747_v34 = vmul.f32 %v744_v18, %v2081_v21  ;;  %v752_v52 = vpop.permute.xlu1 %751 }
 0x147   : > { %v705_v16 = vadd.f32 %v703_v41, %v693_v27  ;;  %v685_v33 = vadd.f32 %v683_v49, %v669_v47  ;;  %v711_v25 = vmul.f32 %v708_v14, %v679_v29  ;;  %v748_v51 = vmul.f32 %v744_v18, %v2085_v31 }
 0x148   : > { %v714_v44 = vmul.f32 %v708_v14, %v684_v22  ;;  %v712_v63 = vadd.f32 %v710_v20, %v700_v58  ;;  %v749_v10 = vmul.f32 %v744_v18, %v573_v36  ;;  %v754_v39 = vmul.f32 %v752_v52, %v2071_v56 }
 0x149   : > { %v715_v50 = vmul.f32 %v708_v14, %v685_v33  ;;  %v713_v53 = vadd.f32 %v711_v25, %v701_v7  ;;  %v755_v47 = vmul.f32 %v752_v52, %v2073_v1  ;;  %v758_v2 = vmul.f32 %v752_v52, %v2075_v5 }
 0x14a   : > { %v716_v42 = vadd.f32 %v714_v44, %v704_v17  ;;  %v759_v55 = vmul.f32 %v752_v52, %v2077_v11  ;;  %v756_v54 = vadd.f32 %v754_v39, %v746_v45  ;;  %v810_v30 = vmul.f32 %v808_v59, %v2071_v56 }
 0x14b   : > { %v717_v57 = vadd.f32 %v715_v50, %v705_v16  ;;  %v757_v48 = vadd.f32 %v755_v47, %v747_v34  ;;  %v760_v62 = vadd.f32 %v758_v2, %v748_v51  ;;  %v764_v46 = vpop.permute.xlu1 %763  ;;  %v811_v32 = vmul.f32 %v808_v59, %v2073_v1 }
 0x14c   : > { %v761_v0 = vadd.f32 %v759_v55, %v749_v10  ;;  %v766_v4 = vmul.f32 %v764_v46, %v2092_v19  ;;  %v767_v6 = vmul.f32 %v764_v46, %v679_v29  ;;  %v770_v8 = vmul.f32 %v764_v46, %v684_v22  ;;  %v786_v10 = vpop.permute.xlu0 %785 }
 0x14d   : > { %v771_v13 = vmul.f32 %v764_v46, %v685_v33  ;;  %v814_v35 = vmul.f32 %v808_v59, %v2075_v5  ;;  %v815_v58 = vmul.f32 %v808_v59, %v2077_v11 }
 0x14e   : > { %v768_v24 = vadd.f32 %v766_v4, %v756_v54  ;;  %v769_v26 = vadd.f32 %v767_v6, %v757_v48  ;;  %v772_v61 = vadd.f32 %v770_v8, %v760_v62 }
 0x14f   : > { %v773_v9 = vadd.f32 %v771_v13, %v761_v0 }
 0x150   : > { %v778_v28 = vadd.f32 %v776_v15, %v768_v24  ;;  %v779_v37 = vadd.f32 %v776_v15, %v769_v26  ;;  %v800_v38 = vpop.permute.xlu1 %799  ;;  %v780_v3 = vadd.f32 %v776_v15, %v772_v61  ;;  %v864_v46 = vpop.permute.xlu0 %863 }
 0x151   : > { %v802_v40 = vmul.f32 %v800_v38, %v2079_v60  ;;  %v803_v41 = vmul.f32 %v800_v38, %v2081_v21  ;;  %v804_v12 = vmul.f32 %v800_v38, %v2085_v31  ;;  %v805_v43 = vmul.f32 %v800_v38, %v573_v36 }
 0x152   : > { %1390 = vtanh.f32 %v778_v28  ;;  %v781_v7 = vadd.f32 %v776_v15, %v773_v9 }
 0x153   : > { %v812_v23 = vadd.f32 %v810_v30, %v802_v40  ;;  %v813_v27 = vadd.f32 %v811_v32, %v803_v41  ;;  %v816_v56 = vadd.f32 %v814_v35, %v804_v12  ;;  %v817_v1 = vadd.f32 %v815_v58, %v805_v43 }
 0x154   : > { %1392 = vtanh.f32 %v779_v37 }
 0x155   : > { %v820_v5 = vpop.permute.xlu1 %819  ;;  %1394 = vtanh.f32 %v780_v3 }
 0x156   : > { %v822_v49 = vmul.f32 %v820_v5, %v2092_v19  ;;  %v823_v17 = vmul.f32 %v820_v5, %v679_v29  ;;  %v826_v60 = vmul.f32 %v820_v5, %v684_v22  ;;  %v827_v18 = vmul.f32 %v820_v5, %v685_v33 }
 0x157   : > { %1396 = vtanh.f32 %v781_v7 }
 0x158   : > { %v824_v21 = vadd.f32 %v822_v49, %v812_v23  ;;  %v825_v31 = vadd.f32 %v823_v17, %v813_v27  ;;  %v828_v36 = vadd.f32 %v826_v60, %v816_v56  ;;  %v829_v14 = vadd.f32 %v827_v18, %v817_v1 }
 0x15a   : > { %v720_v11 = vpop.permute.xlu1 %719 }
 0x15b   : > { %v722_v16 = vadd.f32 %v720_v11, %v712_v63  ;;  %v723_v20 = vadd.f32 %v720_v11, %v713_v53  ;;  %v724_v25 = vadd.f32 %v720_v11, %v716_v42  ;;  %v725_v44 = vadd.f32 %v720_v11, %v717_v57 }
 0x15d   : > { %1398 = vtanh.f32 %v722_v16 }
 0x15e   : > { %1400 = vtanh.f32 %v723_v20 }
 0x15f   : > { %1402 = vtanh.f32 %v724_v25  ;;  %v832_v45 = vpop.permute.xlu1 %831  ;;  %v1391_v33 = vpop.eup %1390 }
 0x160   : > { %1404 = vtanh.f32 %v725_v44  ;;  %v834_v19 = vadd.f32 %v832_v45, %v824_v21  ;;  %v835_v29 = vadd.f32 %v832_v45, %v825_v31  ;;  %v836_v22 = vadd.f32 %v832_v45, %v828_v36 }
 0x161   : > { %v837_v34 = vadd.f32 %v832_v45, %v829_v14  ;;  %v1393_v50 = vpop.eup %1392  ;;  %v788_v53 = vmul.f32 %v1391_v33, %v786_v10 }
 0x162   : > { %1406 = vtanh.f32 %v834_v19  ;;  %v1395_v51 = vpop.eup %1394  ;;  %v789_v42 = vmul.f32 %v1393_v50, %v786_v10 }
 0x163   : > { %1408 = vtanh.f32 %v835_v29  ;;  %v794_v39 = vmul.f32 %v1395_v51, %v786_v10  ;;  %v790_v59 = vadd.f32 %v788_v53, %v778_v28 }
 0x164   : > { %1410 = vtanh.f32 %v836_v22  ;;  %v1397_v52 = vpop.eup %1396  ;;  %v791_v54 = vadd.f32 %v789_v42, %v779_v37 }
 0x165   : > { %v730_v63 = vpop.permute.xlu1 %729  ;;  %1412 = vtanh.f32 %v837_v34  ;;  %v795_v47 = vmul.f32 %v1397_v52, %v786_v10  ;;  %v796_v0 = vadd.f32 %v794_v39, %v780_v3  ;;  %v866_v30 = vmul.f32 %v864_v46, %v790_v59 }
 0x166   : > { %v867_v32 = vmul.f32 %v864_v46, %v791_v54 }
 0x167   : > { %v797_v8 = vadd.f32 %v795_v47, %v781_v7  ;;  %v870_v28 = vmul.f32 %v864_v46, %v796_v0 }
 0x169   : > { %v871_v58 = vmul.f32 %v864_v46, %v797_v8 }
 0x16a   : > { %v842_v2 = vpop.permute.xlu1 %841  ;;  %v1399_v55 = vpop.eup %1398 }
 0x16b   : > { %v1401_v57 = vpop.eup %1400  ;;  %v732_v48 = vmul.f32 %v1399_v55, %v730_v63 }
 0x16c   : > { %v1403_v62 = vpop.eup %1402  ;;  %v733_v4 = vmul.f32 %v1401_v57, %v730_v63 }
 0x16d   : > { %v1405_v6 = vpop.eup %1404  ;;  %v738_v13 = vmul.f32 %v1403_v62, %v730_v63  ;;  %v734_v15 = vadd.f32 %v732_v48, %v722_v16 }
 0x16e   : > { %v739_v24 = vmul.f32 %v1405_v6, %v730_v63  ;;  %v735_v61 = vadd.f32 %v733_v4, %v723_v20 }
 0x16f   : > { %v856_v26 = vpop.permute.xlu1 %855  ;;  %v1407_v9 = vpop.eup %1406  ;;  %v740_v35 = vadd.f32 %v738_v13, %v724_v25 }
 0x170   : > { %v858_v38 = vmul.f32 %v856_v26, %v734_v15  ;;  %v1409_v40 = vpop.eup %1408  ;;  %v844_v37 = vmul.f32 %v1407_v9, %v842_v2  ;;  %v741_v41 = vadd.f32 %v739_v24, %v725_v44  ;;  %v859_v12 = vmul.f32 %v856_v26, %v735_v61 }
 0x171   : > { %v1411_v43 = vpop.eup %1410  ;;  %v845_v3 = vmul.f32 %v1409_v40, %v842_v2  ;;  %v860_v23 = vmul.f32 %v856_v26, %v740_v35 }
 0x172   : > { %v868_v27 = vadd.f32 %v866_v30, %v858_v38  ;;  %v1413_v56 = vpop.eup %1412  ;;  %v850_v1 = vmul.f32 %v1411_v43, %v842_v2  ;;  %v861_v7 = vmul.f32 %v856_v26, %v741_v41  ;;  %v846_v5 = vadd.f32 %v844_v37, %v834_v19 }
 0x173   : > { %v869_v49 = vadd.f32 %v867_v32, %v859_v12  ;;  %v851_v17 = vmul.f32 %v1413_v56, %v842_v2  ;;  %v847_v18 = vadd.f32 %v845_v3, %v835_v29  ;;  %v872_v21 = vadd.f32 %v870_v28, %v860_v23 }
 0x174   : > { %v876_v60 = vpop.permute.xlu1 %875  ;;  %v852_v31 = vadd.f32 %v850_v1, %v836_v22  ;;  %v873_v14 = vadd.f32 %v871_v58, %v861_v7 }
 0x175   : > { %v878_v36 = vmul.f32 %v876_v60, %v846_v5  ;;  %v853_v11 = vadd.f32 %v851_v17, %v837_v34  ;;  %v879_v16 = vmul.f32 %v876_v60, %v847_v18 }
 0x176   : > { %v882_v20 = vmul.f32 %v876_v60, %v852_v31 }
 0x177   : > { %v880_v25 = vadd.f32 %v878_v36, %v868_v27  ;;  %v883_v44 = vmul.f32 %v876_v60, %v853_v11  ;;  %v881_v45 = vadd.f32 %v879_v16, %v869_v49 }
 0x178   : > { %v884_v50 = vadd.f32 %v882_v20, %v872_v21 }
 0x179   : > { %v888_v33 = vpop.permute.xlu1 %887  ;;  %v885_v51 = vadd.f32 %v883_v44, %v873_v14 }
 0x17a   : > { %v890_v10 = vadd.f32 %v888_v33, %v880_v25  ;;  %v891_v63 = vadd.f32 %v888_v33, %v881_v45  ;;  %v892_v19 = vadd.f32 %v888_v33, %v884_v50 }
 0x17b   : > { %v893_v52 = vadd.f32 %v888_v33, %v885_v51 }
 0x17c   : > { %v898_v53 = vmul.f32 0.5, %v890_v10  ;;  %v894_v42 = vmul.f32 0.5, %v892_v19  ;;  %v899_v29 = vmul.f32 0.5, %v891_v63 }
 0x17d   : > { %v895_v22 = vmul.f32 0.5, %v893_v52 }
 0x17e   : > { %1414 = vtanh.f32 %v898_v53 }
 0x17f   : > { %1416 = vtanh.f32 %v894_v42 }
 0x180   : > { %1418 = vtanh.f32 %v895_v22 }
 0x181   : > { %1420 = vtanh.f32 %v899_v29 }
 0x18b   : > { %v1415_v34 = vpop.eup %1414 }
 0x18c   : > { %v1417_v39 = vpop.eup %1416 }
 0x18d   : > { %v1419_v47 = vpop.eup %1418  ;;  %v902_v2 = vsub.f32 %v1417_v39, %v1415_v34 }
 0x18e   : > { %v1421_v55 = vpop.eup %1420 }
 0x18f   : > { %v903_v57 = vsub.f32 %v1419_v47, %v1421_v55  ;;  %v904_v59 = vand.u32 2147483647, %v902_v2 }
 0x191   : > { %v905_v54 = vand.u32 2147483647, %v903_v57  ;;  %v906_v48 = vmul.f32 0.5, %v904_v59 }
 0x193   : > { %v907_v62 = vmul.f32 0.5, %v905_v54  ;;  %v908_v0 = vmax.f32 %v906_v48, 1e-09 }
 0x195   : > { %v909_v46 = vmax.f32 %v907_v62, 1e-09  ;;  %910 = vst [vmem:[%s230_s19] sm:$0xff] %v908_v0 }
 0x197   : > { %911 = vst [vmem:[%s230_s19 + $0x8] sm:$0xff] %v909_v46 }
 0x198   : > { %1515 = shalt.err (!%p1512_p5)
}
 0x199   : > { %s1516_s15 = scalar_lea.hbm %s948_s30, 256  ;;  %s1520_s6 = scalar_lea.hbm %s2156_s3, 512 }
 0x19a   : > { %p1517_p7 = scmp.ne.s32.totalorder %s948_s30, %s1516_s15  ;;  %p1521_p10 = scmp.lt.s32.totalorder %s948_s30, %s2156_s3 }
 0x19b   : > { %p1522_p9 = scmp.lt.s32.totalorder %s1520_s6, %s1516_s15 }
 0x19c   : > { %p1518_p6 = pnand %p1517_p7, %p1761_p0 }
 0x19d   : > { %p1523_p1 = por %p1522_p9, %p1521_p10 }
 0x19e   : > { %p1519_p4 = pneg %p1518_p6 }
 0x1a0   : > { %p1524_p8 = pnand %p1523_p1, %p1519_p4 }
 0x1a2   : > { %1527 = shalt.err (!%p1524_p8)
}
 0x1a3   : > { %1128 = dma.vmem_to_hbm [thread:$0]  (%p1761_p0), %s951_s25, 256, %s948_s30, %s918_s21  }
 0x1a4 PF: > { %s962_s20 = sand.u32 1, %s1570_s12   ;;  %p2167_p13 = scmp.ne.s32.totalorder %s2161_s23, 0 }
 0x1a5   : > { %p2168_p11 = scmp.ge.s32.totalorder %s1590_s17, 2  ;;  %s963_s24 = scalar_lea.sflag [#allocation4], %s962_s20 }
 0x1a7   : > { %p1140_p2 = pnand %p2168_p11, %p2167_p13 }
 0x1a9   : > { %p1141_p12 = pneg %p1140_p2 }
 0x1ab   : > { %1561 = dma.done.wait (%p1141_p12), %s963_s24, 256  }
 0x1ac   : > { %1563 = vsyncadd (%p1141_p12), %s963_s24, 4294967040  ;;  %s972_s19 = scalar_lea.sflag [#allocation9], %s962_s20 }
 0x1ad   : > { %1565 = dma.done.wait (%p1141_p12), %s972_s19, 256  }
 0x1ae   : > { %1567 = vsyncadd (%p1141_p12), %s972_s19, 4294967040  ;;  %s24_s17 = sadd.s32 1, %s1590_s17   ;;  %s2169_s12 = smov %s1574_s13 }
 0x1af   : > { %p21_p3 = scmp.ge.s32.totalorder %s24_s17, 4   ;;  %s2170_s13 = smov %s1578_s14 }
 0x1b0   : > { %s2171_s14 = smov %s1767_s9  ;;  %s2172_s15 = smov %s1586_s16 }
 0x1b1   : > { %s2173_s16 = smov %s2175_s28  ;;  %23 = sbr.rel (!%p21_p3) target bundleno = 9 (0x9), region = 94 }
 0x1b6   :  { %977 = vsyncpa [#allocation3], 1 }
 0x1b7   :  { %979 = vsyncpa [#allocation3 + $0x1], 1 }
 0x1b8   :  { %980 = vsyncpa [#allocation6], 1 }
 0x1b9   :  { %981 = vsyncpa [#allocation4], 1 }
 0x1ba   :  { %983 = vsyncpa [#allocation4 + $0x1], 1 }
 0x1bb   :  { %984 = vsyncpa [#allocation9], 1 }
 0x1bc   :  { %986 = vsyncpa [#allocation9 + $0x1], 1 }

</bundles_post_ra>
